<compile_context>
chip_gen: v7x
topology: tpu7x:2x2x1
jax: 0.10.0
libtpu: 0.0.40
codegen_flags: <defaults>
</compile_context>

<pallas_src>
import functools
import math

import jax
import jax.numpy as jnp
from jax.experimental import pallas as pl
from jax.experimental.pallas import tpu as pltpu


# -----------------------------------------------------------------------------
# In-kernel helpers (traced inside Pallas kernel bodies)
# -----------------------------------------------------------------------------
def _layernorm(x, g, b, eps):
    mean = jnp.mean(x, axis=-1, keepdims=True)
    xc = x - mean
    var = jnp.mean(xc * xc, axis=-1, keepdims=True)
    return xc * jax.lax.rsqrt(var + eps) * g + b


def _mha(q2, k2, v2, wo, bo, nhead, nb_q, sq, nb_kv, sk):
    """Multi-head attention on already-projected (and pre-scaled) q/k/v.

    q2: (nb_q*sq, D) f32, k2/v2: (nb_kv*sk, D) f32, wo: (D, D) bf16,
    bo: (1, D) f32.  If nb_q > nb_kv the kv batch is broadcast (cross-attn
    sharing memory across instruments).  Returns (nb_q*sq, D) f32.
    Per-head output projection is accumulated so the matmul outputs stay
    full-D lane-dense (no concat, no transposes).
    """
    D = q2.shape[-1]
    dh = D // nhead
    q3 = q2.reshape(nb_q, sq, D).astype(jnp.bfloat16)
    k3 = k2.reshape(nb_kv, sk, D).astype(jnp.bfloat16)
    v3 = v2.reshape(nb_kv, sk, D).astype(jnp.bfloat16)
    if nb_q != nb_kv:                       # broadcast memory across instruments
        r = nb_q // nb_kv
        k3 = jnp.broadcast_to(k3[None], (r, nb_kv, sk, D)).reshape(nb_q, sk, D)
        v3 = jnp.broadcast_to(v3[None], (r, nb_kv, sk, D)).reshape(nb_q, sk, D)

    acc = None
    for h in range(nhead):
        sl = slice(h * dh, (h + 1) * dh)
        s = jnp.einsum('bqd,bkd->bqk', q3[:, :, sl], k3[:, :, sl],
                       preferred_element_type=jnp.float32)          # (nb_q,sq,sk)
        m = jnp.max(s, axis=-1, keepdims=True)
        p = jnp.exp(s - m)                                           # f32 softmax
        p = p * pl.reciprocal(jnp.sum(p, axis=-1, keepdims=True), approx=True)
        ctx = jnp.einsum('bqk,bkd->bqd', p.astype(jnp.bfloat16), v3[:, :, sl],
                         preferred_element_type=jnp.float32)         # (nb_q,sq,dh)
        contrib = jnp.dot(ctx.reshape(nb_q * sq, dh).astype(jnp.bfloat16),
                          wo[sl, :], preferred_element_type=jnp.float32)
        acc = contrib if acc is None else acc + contrib
    return acc + bo


# -----------------------------------------------------------------------------
# Kernels
# -----------------------------------------------------------------------------
def _encoder_stack_kernel(style_ref, prompt_ref, ws_ref, bs_ref,
                          wqkv_ref, bqkv_ref, wo_ref, bo_ref,
                          ln1g_ref, ln1b_ref,
                          w1_ref, b1_ref, w2_ref, b2_ref,
                          ln2g_ref, ln2b_ref,
                          encg_ref, encb_ref,
                          o_ref, *, nhead, eps):
    l = pl.program_id(0)
    B, S, D = o_ref.shape

    # Layer-0 prologue: src = prompt + tanh(style @ Ws + bs)[:, None, :]
    @pl.when(l == 0)
    def _():
        latent = jnp.tanh(
            jnp.dot(style_ref[...].astype(jnp.bfloat16), ws_ref[...],
                    preferred_element_type=jnp.float32) + bs_ref[...])
        o_ref[...] = prompt_ref[...] + latent[:, None, :]

    x2 = o_ref[...].reshape(B * S, D)            # carried activation (f32)

    # --- self-attention (packed QKV, batch folded into M) + residual + LN ---
    qkv = jnp.dot(x2.astype(jnp.bfloat16), wqkv_ref[0],
                  preferred_element_type=jnp.float32) + bqkv_ref[0]
    a = _mha(qkv[:, :D], qkv[:, D:2 * D], qkv[:, 2 * D:],
             wo_ref[0], bo_ref[0], nhead, B, S, B, S)
    x2 = _layernorm(x2 + a, ln1g_ref[0], ln1b_ref[0], eps)

    # --- FFN (ReLU) + residual + LN ---
    h = jnp.maximum(jnp.dot(x2.astype(jnp.bfloat16), w1_ref[0],
                            preferred_element_type=jnp.float32) + b1_ref[0], 0.0)
    y = jnp.dot(h.astype(jnp.bfloat16), w2_ref[0],
                preferred_element_type=jnp.float32) + b2_ref[0]
    y = _layernorm(x2 + y, ln2g_ref[0], ln2b_ref[0], eps)

    o_ref[...] = y.reshape(B, S, D)

    # Fused final encoder LayerNorm on the last layer.
    @pl.when(l == pl.num_programs(0) - 1)
    def _():
        o_ref[...] = _layernorm(y, encg_ref[...], encb_ref[...], eps).reshape(B, S, D)


def _decoder_stack_kernel(tgt_ref, mem_ref,
                          swqkv_ref, sbqkv_ref, swo_ref, sbo_ref,
                          ln1g_ref, ln1b_ref,
                          cwq_ref, cbq_ref, cwkv_ref, cbkv_ref, cwo_ref, cbo_ref,
                          ln2g_ref, ln2b_ref,
                          w1_ref, b1_ref, w2_ref, b2_ref,
                          ln3g_ref, ln3b_ref,
                          decg_ref, decb_ref,
                          o_ref, *, nhead, eps):
    l = pl.program_id(0)
    N, B, St, D = o_ref.shape
    Ss = mem_ref.shape[1]

    @pl.when(l == 0)
    def _():
        o_ref[...] = tgt_ref[...]

    x2 = o_ref[...].reshape(N * B * St, D)       # carried activation (f32)
    mem2 = mem_ref[...].reshape(B * Ss, D)

    # --- self-attention (all instruments+batch folded into M) + residual + LN
    qkv = jnp.dot(x2.astype(jnp.bfloat16), swqkv_ref[0],
                  preferred_element_type=jnp.float32) + sbqkv_ref[0]
    a = _mha(qkv[:, :D], qkv[:, D:2 * D], qkv[:, 2 * D:],
             swo_ref[0], sbo_ref[0], nhead, N * B, St, N * B, St)
    x2 = _layernorm(x2 + a, ln1g_ref[0], ln1b_ref[0], eps)

    # --- cross-attention: KV projected ONCE per layer (instrument-invariant)
    q = jnp.dot(x2.astype(jnp.bfloat16), cwq_ref[0],
                preferred_element_type=jnp.float32) + cbq_ref[0]
    kv = jnp.dot(mem2.astype(jnp.bfloat16), cwkv_ref[0],
                 preferred_element_type=jnp.float32) + cbkv_ref[0]
    c = _mha(q, kv[:, :D], kv[:, D:], cwo_ref[0], cbo_ref[0],
             nhead, N * B, St, B, Ss)
    x2 = _layernorm(x2 + c, ln2g_ref[0], ln2b_ref[0], eps)

    # --- FFN + residual + LN ---
    h = jnp.maximum(jnp.dot(x2.astype(jnp.bfloat16), w1_ref[0],
                            preferred_element_type=jnp.float32) + b1_ref[0], 0.0)
    y = jnp.dot(h.astype(jnp.bfloat16), w2_ref[0],
                preferred_element_type=jnp.float32) + b2_ref[0]
    y = _layernorm(x2 + y, ln3g_ref[0], ln3b_ref[0], eps)

    o_ref[...] = y.reshape(N, B, St, D)

    # Fused final decoder LayerNorm on the last layer.
    @pl.when(l == pl.num_programs(0) - 1)
    def _():
        o_ref[...] = _layernorm(y, decg_ref[...], decb_ref[...],
                                eps).reshape(N, B, St, D)


def _heads_kernel(x_ref, w_ref, b_ref, o_ref):
    o_ref[0] = (jnp.dot(x_ref[0].astype(jnp.bfloat16), w_ref[0],
                        preferred_element_type=jnp.float32) + b_ref[0])


# -----------------------------------------------------------------------------
# pallas_call wrappers
# -----------------------------------------------------------------------------
def _const_spec(shape):
    nd = len(shape)
    return pl.BlockSpec(tuple(shape), lambda l, nd=nd: (0,) * nd)


def _layer_spec(shape):
    nd = len(shape)
    return pl.BlockSpec((1,) + tuple(shape), lambda l, nd=nd: (l,) + (0,) * nd)


def encoder_stack_call(style_tokens, prompt_tokens, style_w, style_b,
                       ep, enc_g, enc_b, nhead):
    B, S, D = prompt_tokens.shape
    Sd = style_tokens.shape[1]
    L = ep["wqkv"].shape[0]
    F = ep["w1"].shape[-1]
    return pl.pallas_call(
        functools.partial(_encoder_stack_kernel, nhead=nhead, eps=1e-5),
        out_shape=jax.ShapeDtypeStruct((B, S, D), jnp.float32),
        grid=(L,),
        in_specs=[
            _const_spec((B, Sd)), _const_spec((B, S, D)),
            _const_spec((Sd, D)), _const_spec((1, D)),
            _layer_spec((D, 3 * D)), _layer_spec((1, 3 * D)),
            _layer_spec((D, D)), _layer_spec((1, D)),
            _layer_spec((1, D)), _layer_spec((1, D)),
            _layer_spec((D, F)), _layer_spec((1, F)),
            _layer_spec((F, D)), _layer_spec((1, D)),
            _layer_spec((1, D)), _layer_spec((1, D)),
            _const_spec((1, D)), _const_spec((1, D)),
        ],
        out_specs=pl.BlockSpec((B, S, D), lambda l: (0, 0, 0)),
        compiler_params=pltpu.CompilerParams(dimension_semantics=("arbitrary",)),
    )(style_tokens, prompt_tokens, style_w, style_b,
      ep["wqkv"], ep["bqkv"], ep["wo"], ep["bo"],
      ep["ln1_g"], ep["ln1_b"],
      ep["w1"], ep["b1"], ep["w2"], ep["b2"],
      ep["ln2_g"], ep["ln2_b"],
      enc_g, enc_b)


def decoder_stack_call(tgt_all, mem, dp, dec_g, dec_b, nhead):
    N, B, St, D = tgt_all.shape
    Ss = mem.shape[1]
    L = dp["swqkv"].shape[0]
    F = dp["w1"].shape[-1]
    return pl.pallas_call(
        functools.partial(_decoder_stack_kernel, nhead=nhead, eps=1e-5),
        out_shape=jax.ShapeDtypeStruct((N, B, St, D), jnp.float32),
        grid=(L,),
        in_specs=[
            _const_spec((N, B, St, D)), _const_spec((B, Ss, D)),
            _layer_spec((D, 3 * D)), _layer_spec((1, 3 * D)),
            _layer_spec((D, D)), _layer_spec((1, D)),
            _layer_spec((1, D)), _layer_spec((1, D)),
            _layer_spec((D, D)), _layer_spec((1, D)),
            _layer_spec((D, 2 * D)), _layer_spec((1, 2 * D)),
            _layer_spec((D, D)), _layer_spec((1, D)),
            _layer_spec((1, D)), _layer_spec((1, D)),
            _layer_spec((D, F)), _layer_spec((1, F)),
            _layer_spec((F, D)), _layer_spec((1, D)),
            _layer_spec((1, D)), _layer_spec((1, D)),
            _const_spec((1, D)), _const_spec((1, D)),
        ],
        out_specs=pl.BlockSpec((N, B, St, D), lambda l: (0, 0, 0, 0)),
        compiler_params=pltpu.CompilerParams(dimension_semantics=("arbitrary",)),
    )(tgt_all, mem,
      dp["swqkv"], dp["sbqkv"], dp["swo"], dp["sbo"], dp["ln1_g"], dp["ln1_b"],
      dp["cwq"], dp["cbq"], dp["cwkv"], dp["cbkv"], dp["cwo"], dp["cbo"],
      dp["ln2_g"], dp["ln2_b"],
      dp["w1"], dp["b1"], dp["w2"], dp["b2"], dp["ln3_g"], dp["ln3_b"],
      dec_g, dec_b)


def heads_call(decoded, w, b):
    """decoded: (N, B, St, D) f32; w: (N, D, V) bf16; b: (N, 1, V) f32."""
    N, B, St, D = decoded.shape
    V = w.shape[-1]
    x = decoded.reshape(N, B * St, D)
    out = pl.pallas_call(
        _heads_kernel,
        out_shape=jax.ShapeDtypeStruct((N, B * St, V), jnp.float32),
        grid=(N,),
        in_specs=[
            pl.BlockSpec((1, B * St, D), lambda i: (i, 0, 0)),
            pl.BlockSpec((1, D, V), lambda i: (i, 0, 0)),
            pl.BlockSpec((1, 1, V), lambda i: (i, 0, 0)),
        ],
        out_specs=pl.BlockSpec((1, B * St, V), lambda i: (i, 0, 0)),
        compiler_params=pltpu.CompilerParams(dimension_semantics=("parallel",)),
    )(x, w, b)
    return out.reshape(N, B, St, V)


# -----------------------------------------------------------------------------
# Forward pass (3 pallas_calls total)
# -----------------------------------------------------------------------------
def multi_instrument_forward(params, style_tokens, prompt_tokens,
                             instrument_prompts, nhead):
    mem = encoder_stack_call(style_tokens, prompt_tokens,
                             params["style_w"], params["style_b"],
                             params["encoder"],
                             params["enc_norm_g"], params["enc_norm_b"], nhead)
    decoded = decoder_stack_call(instrument_prompts, mem, params["decoder"],
                                 params["dec_norm_g"], params["dec_norm_b"], nhead)
    logits = heads_call(decoded, params["heads_w"], params["heads_b"])
    return [logits[i] for i in range(params["instrument_count"])]


# -----------------------------------------------------------------------------
# Deterministic parameter init (layer-stacked, bf16 matmul weights,
# attention scale pre-folded into the Q columns).
# NOTE: importing real PyTorch checkpoints requires transposing in_proj_weight
# and folding 1/sqrt(head_dim) into the Q weight AND Q bias.
# -----------------------------------------------------------------------------
def _randw(key, shape, scale=0.02):
    return jax.random.normal(key, shape, jnp.float32) * scale


def init_params(key, vocab_size, instrument_count, style_dim, d_model, nhead,
                num_layers, d_ff):
    assert d_model % nhead == 0
    D, F, L = d_model, d_ff, num_layers
    attn_scale = 1.0 / math.sqrt(D // nhead)
    bf = lambda a: a.astype(jnp.bfloat16)
    zeros = lambda shape: jnp.zeros(shape, jnp.float32)
    ones = lambda shape: jnp.ones(shape, jnp.float32)
    keys = jax.random.split(key, 12)

    enc_wqkv = _randw(keys[0], (L, D, 3 * D)).at[:, :, :D].multiply(attn_scale)
    encoder = dict(
        wqkv=bf(enc_wqkv), bqkv=zeros((L, 1, 3 * D)),
        wo=bf(_randw(keys[1], (L, D, D))), bo=zeros((L, 1, D)),
        ln1_g=ones((L, 1, D)), ln1_b=zeros((L, 1, D)),
        w1=bf(_randw(keys[2], (L, D, F))), b1=zeros((L, 1, F)),
        w2=bf(_randw(keys[3], (L, F, D))), b2=zeros((L, 1, D)),
        ln2_g=ones((L, 1, D)), ln2_b=zeros((L, 1, D)),
    )

    dec_swqkv = _randw(keys[4], (L, D, 3 * D)).at[:, :, :D].multiply(attn_scale)
    decoder = dict(
        swqkv=bf(dec_swqkv), sbqkv=zeros((L, 1, 3 * D)),
        swo=bf(_randw(keys[5], (L, D, D))), sbo=zeros((L, 1, D)),
        ln1_g=ones((L, 1, D)), ln1_b=zeros((L, 1, D)),
        cwq=bf(_randw(keys[6], (L, D, D)) * attn_scale), cbq=zeros((L, 1, D)),
        cwkv=bf(_randw(keys[7], (L, D, 2 * D))), cbkv=zeros((L, 1, 2 * D)),
        cwo=bf(_randw(keys[8], (L, D, D))), cbo=zeros((L, 1, D)),
        ln2_g=ones((L, 1, D)), ln2_b=zeros((L, 1, D)),
        w1=bf(_randw(keys[9], (L, D, F))), b1=zeros((L, 1, F)),
        w2=bf(_randw(keys[10], (L, F, D))), b2=zeros((L, 1, D)),
        ln3_g=ones((L, 1, D)), ln3_b=zeros((L, 1, D)),
    )

    hk, sk = jax.random.split(keys[11])
    return dict(
        instrument_count=instrument_count,
        style_w=bf(_randw(sk, (style_dim, D))), style_b=zeros((1, D)),
        encoder=encoder, decoder=decoder,
        enc_norm_g=ones((1, D)), enc_norm_b=zeros((1, D)),
        dec_norm_g=ones((1, D)), dec_norm_b=zeros((1, D)),
        heads_w=bf(_randw(hk, (instrument_count, D, vocab_size))),
        heads_b=zeros((instrument_count, 1, vocab_size)),
    )


# -----------------------------------------------------------------------------
# Pure-JAX f32 reference (same packed params) for a loose sanity check.
# -----------------------------------------------------------------------------
def _ref_forward(params, style_tokens, prompt_tokens, instrument_prompts, nhead):
    f = lambda a: jnp.asarray(a, jnp.float32)
    eps = 1e-5

    def ln(x, g, b):
        m = jnp.mean(x, axis=-1, keepdims=True)
        v = jnp.mean((x - m) ** 2, axis=-1, keepdims=True)
        return (x - m) / jnp.sqrt(v + eps) * f(g) + f(b)

    def mha(q, k, v, wo, bo):
        D = q.shape[-1]
        dh = D // nhead
        qs = q.reshape(q.shape[:-1] + (nhead, dh))
        ks = k.reshape(k.shape[:-1] + (nhead, dh))
        vs = v.reshape(v.shape[:-1] + (nhead, dh))
        s = jnp.einsum('...qhd,...khd->...hqk', qs, ks)
        p = jax.nn.softmax(s, axis=-1)
        ctx = jnp.einsum('...hqk,...khd->...qhd', p, vs).reshape(q.shape)
        return ctx @ f(wo) + f(bo)

    ep, dp = params["encoder"], params["decoder"]
    L = ep["wqkv"].shape[0]
    D = prompt_tokens.shape[-1]

    style_latent = jnp.tanh(style_tokens @ f(params["style_w"]) + f(params["style_b"]))
    x = prompt_tokens + style_latent[:, None, :]
    for l in range(L):
        qkv = x @ f(ep["wqkv"][l]) + f(ep["bqkv"][l])
        a = mha(qkv[..., :D], qkv[..., D:2 * D], qkv[..., 2 * D:],
                ep["wo"][l], ep["bo"][l])
        x = ln(x + a, ep["ln1_g"][l], ep["ln1_b"][l])
        h = jax.nn.relu(x @ f(ep["w1"][l]) + f(ep["b1"][l]))
        x = ln(x + (h @ f(ep["w2"][l]) + f(ep["b2"][l])), ep["ln2_g"][l], ep["ln2_b"][l])
    mem = ln(x, params["enc_norm_g"], params["enc_norm_b"])

    t = instrument_prompts
    N = t.shape[0]
    for l in range(L):
        qkv = t @ f(dp["swqkv"][l]) + f(dp["sbqkv"][l])
        a = mha(qkv[..., :D], qkv[..., D:2 * D], qkv[..., 2 * D:],
                dp["swo"][l], dp["sbo"][l])
        t = ln(t + a, dp["ln1_g"][l], dp["ln1_b"][l])
        q = t @ f(dp["cwq"][l]) + f(dp["cbq"][l])
        kv = mem @ f(dp["cwkv"][l]) + f(dp["cbkv"][l])
        kvb = jnp.broadcast_to(kv[None], (N,) + kv.shape)
        c = mha(q, kvb[..., :D], kvb[..., D:], dp["cwo"][l], dp["cbo"][l])
        t = ln(t + c, dp["ln2_g"][l], dp["ln2_b"][l])
        h = jax.nn.relu(t @ f(dp["w1"][l]) + f(dp["b1"][l]))
        t = ln(t + (h @ f(dp["w2"][l]) + f(dp["b2"][l])), dp["ln3_g"][l], dp["ln3_b"][l])
    t = ln(t, params["dec_norm_g"], params["dec_norm_b"])
    return jnp.einsum('nbtd,ndv->nbtv', t, f(params["heads_w"])) + f(params["heads_b"])[:, None]


# -----------------------------------------------------------------------------
# Demo
# -----------------------------------------------------------------------------
if __name__ == "__main__":
    B, S_SRC, S_TGT = 2, 8, 8
    VOCAB, N_INST, STYLE_DIM = 128, 2, 16        # lane-dense vocab head
    D_MODEL, NHEAD, N_LAYERS, D_FF = 128, 4, 2, 256

    root = jax.random.PRNGKey(0)
    kp, k1, k2, k3 = jax.random.split(root, 4)

    params = init_params(kp, VOCAB, N_INST, STYLE_DIM, D_MODEL, NHEAD,
                         N_LAYERS, D_FF)

    style_tokens = jax.random.normal(k1, (B, STYLE_DIM), jnp.float32)
    prompt_tokens = jax.random.normal(k2, (B, S_SRC, D_MODEL), jnp.float32)
    instrument_prompts = jax.random.normal(
        k3, (N_INST, B, S_TGT, D_MODEL), jnp.float32)

    outputs = multi_instrument_forward(
        params, style_tokens, prompt_tokens, instrument_prompts, NHEAD)

    for o in outputs:
        jax.block_until_ready(o)
        assert o.shape == (B, S_TGT, VOCAB), o.shape
        assert bool(jnp.all(jnp.isfinite(o)))

    # Loose sanity check vs. a pure-JAX f32 reference (bf16 matmuls + approx
    # reciprocal make this inexact; threshold is generous by design).
    ref = _ref_forward(params, style_tokens, prompt_tokens, instrument_prompts, NHEAD)
    err = float(jnp.max(jnp.abs(jnp.stack(outputs) - ref)))
    assert err < 0.1, f"max abs error vs reference: {err}"

    print("KERNEL_OK")
</pallas_src>

<mosaic_0001>
module attributes {stable_mosaic.version = 11 : i64} {
  func.func @_encoder_stack_kernel(%arg0: i32, %arg1: memref<2x16xf32, #tpu.memory_space<vmem>>, %arg2: memref<2x8x128xf32, #tpu.memory_space<vmem>>, %arg3: memref<16x128xbf16, #tpu.memory_space<vmem>>, %arg4: memref<1x128xf32, #tpu.memory_space<vmem>>, %arg5: memref<1x128x384xbf16, #tpu.memory_space<vmem>>, %arg6: memref<1x1x384xf32, #tpu.memory_space<vmem>>, %arg7: memref<1x128x128xbf16, #tpu.memory_space<vmem>>, %arg8: memref<1x1x128xf32, #tpu.memory_space<vmem>>, %arg9: memref<1x1x128xf32, #tpu.memory_space<vmem>>, %arg10: memref<1x1x128xf32, #tpu.memory_space<vmem>>, %arg11: memref<1x128x256xbf16, #tpu.memory_space<vmem>>, %arg12: memref<1x1x256xf32, #tpu.memory_space<vmem>>, %arg13: memref<1x256x128xbf16, #tpu.memory_space<vmem>>, %arg14: memref<1x1x128xf32, #tpu.memory_space<vmem>>, %arg15: memref<1x1x128xf32, #tpu.memory_space<vmem>>, %arg16: memref<1x1x128xf32, #tpu.memory_space<vmem>>, %arg17: memref<1x128xf32, #tpu.memory_space<vmem>>, %arg18: memref<1x128xf32, #tpu.memory_space<vmem>>, %arg19: memref<2x8x128xf32, #tpu.memory_space<vmem>>) attributes {dimension_semantics = [#tpu.dimension_semantics<arbitrary>], iteration_bounds = array<i64: 2>, scalar_prefetch = 0 : i64, scratch_operands = 0 : i64, tpu.core_type = #tpu.core_type<tc>, window_params = [{pipeline_mode = #tpu.pipeline_mode<synchronous>, transform_indices = @transform_0, window_bounds = array<i64: 2, 16>}, {pipeline_mode = #tpu.pipeline_mode<synchronous>, transform_indices = @transform_1, window_bounds = array<i64: 2, 8, 128>}, {pipeline_mode = #tpu.pipeline_mode<synchronous>, transform_indices = @transform_2, window_bounds = array<i64: 16, 128>}, {pipeline_mode = #tpu.pipeline_mode<synchronous>, transform_indices = @transform_3, window_bounds = array<i64: 1, 128>}, {transform_indices = @transform_4, window_bounds = array<i64: 1, 128, 384>}, {transform_indices = @transform_5, window_bounds = array<i64: 1, 1, 384>}, {transform_indices = @transform_6, window_bounds = array<i64: 1, 128, 128>}, {transform_indices = @transform_7, window_bounds = array<i64: 1, 1, 128>}, {transform_indices = @transform_8, window_bounds = array<i64: 1, 1, 128>}, {transform_indices = @transform_9, window_bounds = array<i64: 1, 1, 128>}, {transform_indices = @transform_10, window_bounds = array<i64: 1, 128, 256>}, {transform_indices = @transform_11, window_bounds = array<i64: 1, 1, 256>}, {transform_indices = @transform_12, window_bounds = array<i64: 1, 256, 128>}, {transform_indices = @transform_13, window_bounds = array<i64: 1, 1, 128>}, {transform_indices = @transform_14, window_bounds = array<i64: 1, 1, 128>}, {transform_indices = @transform_15, window_bounds = array<i64: 1, 1, 128>}, {pipeline_mode = #tpu.pipeline_mode<synchronous>, transform_indices = @transform_16, window_bounds = array<i64: 1, 128>}, {pipeline_mode = #tpu.pipeline_mode<synchronous>, transform_indices = @transform_17, window_bounds = array<i64: 1, 128>}, {pipeline_mode = #tpu.pipeline_mode<synchronous>, transform_indices = @transform_18, window_bounds = array<i64: 2, 8, 128>}]} {
    %c0_i32 = arith.constant 0 : i32
    %0 = arith.cmpi eq, %arg0, %c0_i32 : i32
    %1 = arith.extui %0 : i1 to i32
    %c0_i32_0 = arith.constant 0 : i32
    %2 = arith.cmpi ne, %1, %c0_i32_0 : i32
    scf.if %2 {
      %c0_76 = arith.constant 0 : index
      %c0_77 = arith.constant 0 : index
      %184 = vector.load %arg1[%c0_76, %c0_77] : memref<2x16xf32, #tpu.memory_space<vmem>>, vector<2x16xf32>
      %185 = arith.truncf %184 : vector<2x16xf32> to vector<2x16xbf16>
      %c0_78 = arith.constant 0 : index
      %c0_79 = arith.constant 0 : index
      %186 = vector.load %arg3[%c0_78, %c0_79] : memref<16x128xbf16, #tpu.memory_space<vmem>>, vector<16x128xbf16>
      %cst_80 = arith.constant dense<0.000000e+00> : vector<2x128xf32>
      %187 = tpu.matmul %185, %186, %cst_80 {dimension_numbers = #tpu.dot_dimension_numbers<[1], [0], [0], [1], [0, 0, 1, 1], [], []>} : vector<2x16xbf16>, vector<16x128xbf16>, vector<2x128xf32> -> vector<2x128xf32>
      %c0_81 = arith.constant 0 : index
      %c0_82 = arith.constant 0 : index
      %188 = vector.load %arg4[%c0_81, %c0_82] : memref<1x128xf32, #tpu.memory_space<vmem>>, vector<1x128xf32>
      %189 = vector.broadcast %188 : vector<1x128xf32> to vector<2x128xf32>
      %190 = arith.addf %187, %189 : vector<2x128xf32>
      %191 = math.tanh %190 : vector<2x128xf32>
      %c0_83 = arith.constant 0 : index
      %c0_84 = arith.constant 0 : index
      %c0_85 = arith.constant 0 : index
      %192 = vector.load %arg2[%c0_83, %c0_84, %c0_85] : memref<2x8x128xf32, #tpu.memory_space<vmem>>, vector<2x8x128xf32>
      %193 = vector.shape_cast %191 : vector<2x128xf32> to vector<2x1x128xf32>
      %194 = vector.broadcast %193 : vector<2x1x128xf32> to vector<2x8x128xf32>
      %195 = arith.addf %192, %194 : vector<2x8x128xf32>
      %c0_86 = arith.constant 0 : index
      %c0_87 = arith.constant 0 : index
      %c0_88 = arith.constant 0 : index
      %196 = vector.load %arg19[%c0_86, %c0_87, %c0_88] : memref<2x8x128xf32, #tpu.memory_space<vmem>>, vector<2x8x128xf32>
      tpu.vector_store %arg19[%c0_86, %c0_87, %c0_88], %195 {strides = array<i32>} : memref<2x8x128xf32, #tpu.memory_space<vmem>>, vector<2x8x128xf32>,
    } else {
    }
    %c0 = arith.constant 0 : index
    %c0_1 = arith.constant 0 : index
    %c0_2 = arith.constant 0 : index
    %3 = vector.load %arg19[%c0, %c0_1, %c0_2] : memref<2x8x128xf32, #tpu.memory_space<vmem>>, vector<2x8x128xf32>
    %4 = vector.shape_cast %3 : vector<2x8x128xf32> to vector<16x128xf32>
    %5 = arith.truncf %4 : vector<16x128xf32> to vector<16x128xbf16>
    %c0_3 = arith.constant 0 : index
    %c0_4 = arith.constant 0 : index
    %c0_5 = arith.constant 0 : index
    %6 = vector.load %arg5[%c0_3, %c0_4, %c0_5] : memref<1x128x384xbf16, #tpu.memory_space<vmem>>, vector<1x128x384xbf16>
    %7 = vector.shape_cast %6 : vector<1x128x384xbf16> to vector<128x384xbf16>
    %cst = arith.constant dense<0.000000e+00> : vector<16x384xf32>
    %8 = tpu.matmul %5, %7, %cst {dimension_numbers = #tpu.dot_dimension_numbers<[1], [0], [0], [1], [0, 0, 1, 1], [], []>} : vector<16x128xbf16>, vector<128x384xbf16>, vector<16x384xf32> -> vector<16x384xf32>
    %c0_6 = arith.constant 0 : index
    %c0_7 = arith.constant 0 : index
    %c0_8 = arith.constant 0 : index
    %9 = vector.load %arg6[%c0_6, %c0_7, %c0_8] : memref<1x1x384xf32, #tpu.memory_space<vmem>>, vector<1x1x384xf32>
    %10 = vector.shape_cast %9 : vector<1x1x384xf32> to vector<1x384xf32>
    %11 = vector.broadcast %10 : vector<1x384xf32> to vector<16x384xf32>
    %12 = arith.addf %8, %11 : vector<16x384xf32>
    %13 = vector.extract_strided_slice %12 {offsets = [0, 0], sizes = [16, 128], strides = [1, 1]} : vector<16x384xf32> to vector<16x128xf32>
    %14 = vector.extract_strided_slice %12 {offsets = [0, 128], sizes = [16, 128], strides = [1, 1]} : vector<16x384xf32> to vector<16x128xf32>
    %15 = vector.extract_strided_slice %12 {offsets = [0, 256], sizes = [16, 128], strides = [1, 1]} : vector<16x384xf32> to vector<16x128xf32>
    %c0_9 = arith.constant 0 : index
    %c0_10 = arith.constant 0 : index
    %c0_11 = arith.constant 0 : index
    %16 = vector.load %arg7[%c0_9, %c0_10, %c0_11] : memref<1x128x128xbf16, #tpu.memory_space<vmem>>, vector<1x128x128xbf16>
    %17 = vector.shape_cast %16 : vector<1x128x128xbf16> to vector<128x128xbf16>
    %c0_12 = arith.constant 0 : index
    %c0_13 = arith.constant 0 : index
    %c0_14 = arith.constant 0 : index
    %18 = vector.load %arg8[%c0_12, %c0_13, %c0_14] : memref<1x1x128xf32, #tpu.memory_space<vmem>>, vector<1x1x128xf32>
    %19 = vector.shape_cast %18 : vector<1x1x128xf32> to vector<1x128xf32>
    %20 = vector.shape_cast %13 : vector<16x128xf32> to vector<2x8x128xf32>
    %21 = arith.truncf %20 : vector<2x8x128xf32> to vector<2x8x128xbf16>
    %22 = vector.shape_cast %14 : vector<16x128xf32> to vector<2x8x128xf32>
    %23 = arith.truncf %22 : vector<2x8x128xf32> to vector<2x8x128xbf16>
    %24 = vector.shape_cast %15 : vector<16x128xf32> to vector<2x8x128xf32>
    %25 = arith.truncf %24 : vector<2x8x128xf32> to vector<2x8x128xbf16>
    %26 = vector.extract_strided_slice %21 {offsets = [0, 0, 0], sizes = [2, 8, 32], strides = [1, 1, 1]} : vector<2x8x128xbf16> to vector<2x8x32xbf16>
    %27 = vector.extract_strided_slice %23 {offsets = [0, 0, 0], sizes = [2, 8, 32], strides = [1, 1, 1]} : vector<2x8x128xbf16> to vector<2x8x32xbf16>
    "tpu.trace_start"() <{level = 10 : i32, message = "bqd,bkd->bqk"}> : () -> ()
    %cst_15 = arith.constant dense<0.000000e+00> : vector<2x8x8xf32>
    %28 = tpu.matmul %26, %27, %cst_15 {dimension_numbers = #tpu.dot_dimension_numbers<[2], [2], [1], [1], [0, 0, 0, 1, 1, 1], [0], [0]>} : vector<2x8x32xbf16>, vector<2x8x32xbf16>, vector<2x8x8xf32> -> vector<2x8x8xf32>
    "tpu.trace_stop"() : () -> ()
    %cst_16 = arith.constant dense<0xFF800000> : vector<2x8xf32>
    %29 = vector.multi_reduction <maximumf>, %28, %cst_16 [2] : vector<2x8x8xf32> to vector<2x8xf32>
    %30 = vector.shape_cast %29 : vector<2x8xf32> to vector<2x8x1xf32>
    %31 = vector.broadcast %30 : vector<2x8x1xf32> to vector<2x8x8xf32>
    %32 = arith.subf %28, %31 : vector<2x8x8xf32>
    %33 = math.exp %32 : vector<2x8x8xf32>
    %cst_17 = arith.constant dense<0.000000e+00> : vector<2x8xf32>
    %34 = vector.multi_reduction <add>, %33, %cst_17 [2] : vector<2x8x8xf32> to vector<2x8xf32>
    %35 = vector.shape_cast %34 : vector<2x8xf32> to vector<2x8x1xf32>
    %36 = tpu.reciprocal %35 {approx = true} : vector<2x8x1xf32> -> vector<2x8x1xf32>
    %37 = vector.broadcast %36 : vector<2x8x1xf32> to vector<2x8x8xf32>
    %38 = arith.mulf %33, %37 : vector<2x8x8xf32>
    %39 = arith.truncf %38 : vector<2x8x8xf32> to vector<2x8x8xbf16>
    %40 = vector.extract_strided_slice %25 {offsets = [0, 0, 0], sizes = [2, 8, 32], strides = [1, 1, 1]} : vector<2x8x128xbf16> to vector<2x8x32xbf16>
    "tpu.trace_start"() <{level = 10 : i32, message = "bqk,bkd->bqd"}> : () -> ()
    %cst_18 = arith.constant dense<0.000000e+00> : vector<2x8x32xf32>
    %41 = tpu.matmul %39, %40, %cst_18 {dimension_numbers = #tpu.dot_dimension_numbers<[2], [1], [1], [2], [0, 0, 0, 1, 1, 2], [0], [0]>} : vector<2x8x8xbf16>, vector<2x8x32xbf16>, vector<2x8x32xf32> -> vector<2x8x32xf32>
    "tpu.trace_stop"() : () -> ()
    %42 = vector.shape_cast %41 : vector<2x8x32xf32> to vector<16x32xf32>
    %43 = arith.truncf %42 : vector<16x32xf32> to vector<16x32xbf16>
    %44 = vector.extract_strided_slice %17 {offsets = [0, 0], sizes = [32, 128], strides = [1, 1]} : vector<128x128xbf16> to vector<32x128xbf16>
    %cst_19 = arith.constant dense<0.000000e+00> : vector<16x128xf32>
    %45 = tpu.matmul %43, %44, %cst_19 {dimension_numbers = #tpu.dot_dimension_numbers<[1], [0], [0], [1], [0, 0, 1, 1], [], []>} : vector<16x32xbf16>, vector<32x128xbf16>, vector<16x128xf32> -> vector<16x128xf32>
    %46 = vector.extract_strided_slice %21 {offsets = [0, 0, 32], sizes = [2, 8, 32], strides = [1, 1, 1]} : vector<2x8x128xbf16> to vector<2x8x32xbf16>
    %47 = vector.extract_strided_slice %23 {offsets = [0, 0, 32], sizes = [2, 8, 32], strides = [1, 1, 1]} : vector<2x8x128xbf16> to vector<2x8x32xbf16>
    "tpu.trace_start"() <{level = 10 : i32, message = "bqd,bkd->bqk"}> : () -> ()
    %cst_20 = arith.constant dense<0.000000e+00> : vector<2x8x8xf32>
    %48 = tpu.matmul %46, %47, %cst_20 {dimension_numbers = #tpu.dot_dimension_numbers<[2], [2], [1], [1], [0, 0, 0, 1, 1, 1], [0], [0]>} : vector<2x8x32xbf16>, vector<2x8x32xbf16>, vector<2x8x8xf32> -> vector<2x8x8xf32>
    "tpu.trace_stop"() : () -> ()
    %cst_21 = arith.constant dense<0xFF800000> : vector<2x8xf32>
    %49 = vector.multi_reduction <maximumf>, %48, %cst_21 [2] : vector<2x8x8xf32> to vector<2x8xf32>
    %50 = vector.shape_cast %49 : vector<2x8xf32> to vector<2x8x1xf32>
    %51 = vector.broadcast %50 : vector<2x8x1xf32> to vector<2x8x8xf32>
    %52 = arith.subf %48, %51 : vector<2x8x8xf32>
    %53 = math.exp %52 : vector<2x8x8xf32>
    %cst_22 = arith.constant dense<0.000000e+00> : vector<2x8xf32>
    %54 = vector.multi_reduction <add>, %53, %cst_22 [2] : vector<2x8x8xf32> to vector<2x8xf32>
    %55 = vector.shape_cast %54 : vector<2x8xf32> to vector<2x8x1xf32>
    %56 = tpu.reciprocal %55 {approx = true} : vector<2x8x1xf32> -> vector<2x8x1xf32>
    %57 = vector.broadcast %56 : vector<2x8x1xf32> to vector<2x8x8xf32>
    %58 = arith.mulf %53, %57 : vector<2x8x8xf32>
    %59 = arith.truncf %58 : vector<2x8x8xf32> to vector<2x8x8xbf16>
    %60 = vector.extract_strided_slice %25 {offsets = [0, 0, 32], sizes = [2, 8, 32], strides = [1, 1, 1]} : vector<2x8x128xbf16> to vector<2x8x32xbf16>
    "tpu.trace_start"() <{level = 10 : i32, message = "bqk,bkd->bqd"}> : () -> ()
    %cst_23 = arith.constant dense<0.000000e+00> : vector<2x8x32xf32>
    %61 = tpu.matmul %59, %60, %cst_23 {dimension_numbers = #tpu.dot_dimension_numbers<[2], [1], [1], [2], [0, 0, 0, 1, 1, 2], [0], [0]>} : vector<2x8x8xbf16>, vector<2x8x32xbf16>, vector<2x8x32xf32> -> vector<2x8x32xf32>
    "tpu.trace_stop"() : () -> ()
    %62 = vector.shape_cast %61 : vector<2x8x32xf32> to vector<16x32xf32>
    %63 = arith.truncf %62 : vector<16x32xf32> to vector<16x32xbf16>
    %64 = vector.extract_strided_slice %17 {offsets = [32, 0], sizes = [32, 128], strides = [1, 1]} : vector<128x128xbf16> to vector<32x128xbf16>
    %cst_24 = arith.constant dense<0.000000e+00> : vector<16x128xf32>
    %65 = tpu.matmul %63, %64, %cst_24 {dimension_numbers = #tpu.dot_dimension_numbers<[1], [0], [0], [1], [0, 0, 1, 1], [], []>} : vector<16x32xbf16>, vector<32x128xbf16>, vector<16x128xf32> -> vector<16x128xf32>
    %66 = arith.addf %45, %65 : vector<16x128xf32>
    %67 = vector.extract_strided_slice %21 {offsets = [0, 0, 64], sizes = [2, 8, 32], strides = [1, 1, 1]} : vector<2x8x128xbf16> to vector<2x8x32xbf16>
    %68 = vector.extract_strided_slice %23 {offsets = [0, 0, 64], sizes = [2, 8, 32], strides = [1, 1, 1]} : vector<2x8x128xbf16> to vector<2x8x32xbf16>
    "tpu.trace_start"() <{level = 10 : i32, message = "bqd,bkd->bqk"}> : () -> ()
    %cst_25 = arith.constant dense<0.000000e+00> : vector<2x8x8xf32>
    %69 = tpu.matmul %67, %68, %cst_25 {dimension_numbers = #tpu.dot_dimension_numbers<[2], [2], [1], [1], [0, 0, 0, 1, 1, 1], [0], [0]>} : vector<2x8x32xbf16>, vector<2x8x32xbf16>, vector<2x8x8xf32> -> vector<2x8x8xf32>
    "tpu.trace_stop"() : () -> ()
    %cst_26 = arith.constant dense<0xFF800000> : vector<2x8xf32>
    %70 = vector.multi_reduction <maximumf>, %69, %cst_26 [2] : vector<2x8x8xf32> to vector<2x8xf32>
    %71 = vector.shape_cast %70 : vector<2x8xf32> to vector<2x8x1xf32>
    %72 = vector.broadcast %71 : vector<2x8x1xf32> to vector<2x8x8xf32>
    %73 = arith.subf %69, %72 : vector<2x8x8xf32>
    %74 = math.exp %73 : vector<2x8x8xf32>
    %cst_27 = arith.constant dense<0.000000e+00> : vector<2x8xf32>
    %75 = vector.multi_reduction <add>, %74, %cst_27 [2] : vector<2x8x8xf32> to vector<2x8xf32>
    %76 = vector.shape_cast %75 : vector<2x8xf32> to vector<2x8x1xf32>
    %77 = tpu.reciprocal %76 {approx = true} : vector<2x8x1xf32> -> vector<2x8x1xf32>
    %78 = vector.broadcast %77 : vector<2x8x1xf32> to vector<2x8x8xf32>
    %79 = arith.mulf %74, %78 : vector<2x8x8xf32>
    %80 = arith.truncf %79 : vector<2x8x8xf32> to vector<2x8x8xbf16>
    %81 = vector.extract_strided_slice %25 {offsets = [0, 0, 64], sizes = [2, 8, 32], strides = [1, 1, 1]} : vector<2x8x128xbf16> to vector<2x8x32xbf16>
    "tpu.trace_start"() <{level = 10 : i32, message = "bqk,bkd->bqd"}> : () -> ()
    %cst_28 = arith.constant dense<0.000000e+00> : vector<2x8x32xf32>
    %82 = tpu.matmul %80, %81, %cst_28 {dimension_numbers = #tpu.dot_dimension_numbers<[2], [1], [1], [2], [0, 0, 0, 1, 1, 2], [0], [0]>} : vector<2x8x8xbf16>, vector<2x8x32xbf16>, vector<2x8x32xf32> -> vector<2x8x32xf32>
    "tpu.trace_stop"() : () -> ()
    %83 = vector.shape_cast %82 : vector<2x8x32xf32> to vector<16x32xf32>
    %84 = arith.truncf %83 : vector<16x32xf32> to vector<16x32xbf16>
    %85 = vector.extract_strided_slice %17 {offsets = [64, 0], sizes = [32, 128], strides = [1, 1]} : vector<128x128xbf16> to vector<32x128xbf16>
    %cst_29 = arith.constant dense<0.000000e+00> : vector<16x128xf32>
    %86 = tpu.matmul %84, %85, %cst_29 {dimension_numbers = #tpu.dot_dimension_numbers<[1], [0], [0], [1], [0, 0, 1, 1], [], []>} : vector<16x32xbf16>, vector<32x128xbf16>, vector<16x128xf32> -> vector<16x128xf32>
    %87 = arith.addf %66, %86 : vector<16x128xf32>
    %88 = vector.extract_strided_slice %21 {offsets = [0, 0, 96], sizes = [2, 8, 32], strides = [1, 1, 1]} : vector<2x8x128xbf16> to vector<2x8x32xbf16>
    %89 = vector.extract_strided_slice %23 {offsets = [0, 0, 96], sizes = [2, 8, 32], strides = [1, 1, 1]} : vector<2x8x128xbf16> to vector<2x8x32xbf16>
    "tpu.trace_start"() <{level = 10 : i32, message = "bqd,bkd->bqk"}> : () -> ()
    %cst_30 = arith.constant dense<0.000000e+00> : vector<2x8x8xf32>
    %90 = tpu.matmul %88, %89, %cst_30 {dimension_numbers = #tpu.dot_dimension_numbers<[2], [2], [1], [1], [0, 0, 0, 1, 1, 1], [0], [0]>} : vector<2x8x32xbf16>, vector<2x8x32xbf16>, vector<2x8x8xf32> -> vector<2x8x8xf32>
    "tpu.trace_stop"() : () -> ()
    %cst_31 = arith.constant dense<0xFF800000> : vector<2x8xf32>
    %91 = vector.multi_reduction <maximumf>, %90, %cst_31 [2] : vector<2x8x8xf32> to vector<2x8xf32>
    %92 = vector.shape_cast %91 : vector<2x8xf32> to vector<2x8x1xf32>
    %93 = vector.broadcast %92 : vector<2x8x1xf32> to vector<2x8x8xf32>
    %94 = arith.subf %90, %93 : vector<2x8x8xf32>
    %95 = math.exp %94 : vector<2x8x8xf32>
    %cst_32 = arith.constant dense<0.000000e+00> : vector<2x8xf32>
    %96 = vector.multi_reduction <add>, %95, %cst_32 [2] : vector<2x8x8xf32> to vector<2x8xf32>
    %97 = vector.shape_cast %96 : vector<2x8xf32> to vector<2x8x1xf32>
    %98 = tpu.reciprocal %97 {approx = true} : vector<2x8x1xf32> -> vector<2x8x1xf32>
    %99 = vector.broadcast %98 : vector<2x8x1xf32> to vector<2x8x8xf32>
    %100 = arith.mulf %95, %99 : vector<2x8x8xf32>
    %101 = arith.truncf %100 : vector<2x8x8xf32> to vector<2x8x8xbf16>
    %102 = vector.extract_strided_slice %25 {offsets = [0, 0, 96], sizes = [2, 8, 32], strides = [1, 1, 1]} : vector<2x8x128xbf16> to vector<2x8x32xbf16>
    "tpu.trace_start"() <{level = 10 : i32, message = "bqk,bkd->bqd"}> : () -> ()
    %cst_33 = arith.constant dense<0.000000e+00> : vector<2x8x32xf32>
    %103 = tpu.matmul %101, %102, %cst_33 {dimension_numbers = #tpu.dot_dimension_numbers<[2], [1], [1], [2], [0, 0, 0, 1, 1, 2], [0], [0]>} : vector<2x8x8xbf16>, vector<2x8x32xbf16>, vector<2x8x32xf32> -> vector<2x8x32xf32>
    "tpu.trace_stop"() : () -> ()
    %104 = vector.shape_cast %103 : vector<2x8x32xf32> to vector<16x32xf32>
    %105 = arith.truncf %104 : vector<16x32xf32> to vector<16x32xbf16>
    %106 = vector.extract_strided_slice %17 {offsets = [96, 0], sizes = [32, 128], strides = [1, 1]} : vector<128x128xbf16> to vector<32x128xbf16>
    %cst_34 = arith.constant dense<0.000000e+00> : vector<16x128xf32>
    %107 = tpu.matmul %105, %106, %cst_34 {dimension_numbers = #tpu.dot_dimension_numbers<[1], [0], [0], [1], [0, 0, 1, 1], [], []>} : vector<16x32xbf16>, vector<32x128xbf16>, vector<16x128xf32> -> vector<16x128xf32>
    %108 = arith.addf %87, %107 : vector<16x128xf32>
    %109 = vector.broadcast %19 : vector<1x128xf32> to vector<16x128xf32>
    %110 = arith.addf %108, %109 : vector<16x128xf32>
    %111 = arith.addf %4, %110 : vector<16x128xf32>
    %c0_35 = arith.constant 0 : index
    %c0_36 = arith.constant 0 : index
    %c0_37 = arith.constant 0 : index
    %112 = vector.load %arg9[%c0_35, %c0_36, %c0_37] : memref<1x1x128xf32, #tpu.memory_space<vmem>>, vector<1x1x128xf32>
    %113 = vector.shape_cast %112 : vector<1x1x128xf32> to vector<1x128xf32>
    %c0_38 = arith.constant 0 : index
    %c0_39 = arith.constant 0 : index
    %c0_40 = arith.constant 0 : index
    %114 = vector.load %arg10[%c0_38, %c0_39, %c0_40] : memref<1x1x128xf32, #tpu.memory_space<vmem>>, vector<1x1x128xf32>
    %115 = vector.shape_cast %114 : vector<1x1x128xf32> to vector<1x128xf32>
    %cst_41 = arith.constant dense<0.000000e+00> : vector<16xf32>
    %116 = vector.multi_reduction <add>, %111, %cst_41 [1] : vector<16x128xf32> to vector<16xf32>
    %117 = vector.shape_cast %116 : vector<16xf32> to vector<16x1xf32>
    %cst_42 = arith.constant 1.280000e+02 : f32
    %118 = vector.broadcast %cst_42 : f32 to vector<16x1xf32>
    %119 = arith.divf %117, %118 : vector<16x1xf32>
    %120 = vector.broadcast %119 : vector<16x1xf32> to vector<16x128xf32>
    %121 = arith.subf %111, %120 : vector<16x128xf32>
    %122 = arith.mulf %121, %121 : vector<16x128xf32>
    %cst_43 = arith.constant dense<0.000000e+00> : vector<16xf32>
    %123 = vector.multi_reduction <add>, %122, %cst_43 [1] : vector<16x128xf32> to vector<16xf32>
    %124 = vector.shape_cast %123 : vector<16xf32> to vector<16x1xf32>
    %cst_44 = arith.constant 1.280000e+02 : f32
    %125 = vector.broadcast %cst_44 : f32 to vector<16x1xf32>
    %126 = arith.divf %124, %125 : vector<16x1xf32>
    %cst_45 = arith.constant 9.99999974E-6 : f32
    %127 = vector.broadcast %cst_45 : f32 to vector<16x1xf32>
    %128 = arith.addf %126, %127 : vector<16x1xf32>
    %129 = math.rsqrt %128 : vector<16x1xf32>
    %130 = vector.broadcast %129 : vector<16x1xf32> to vector<16x128xf32>
    %131 = arith.mulf %121, %130 : vector<16x128xf32>
    %132 = vector.broadcast %113 : vector<1x128xf32> to vector<16x128xf32>
    %133 = arith.mulf %131, %132 : vector<16x128xf32>
    %134 = vector.broadcast %115 : vector<1x128xf32> to vector<16x128xf32>
    %135 = arith.addf %133, %134 : vector<16x128xf32>
    %136 = arith.truncf %135 : vector<16x128xf32> to vector<16x128xbf16>
    %c0_46 = arith.constant 0 : index
    %c0_47 = arith.constant 0 : index
    %c0_48 = arith.constant 0 : index
    %137 = vector.load %arg11[%c0_46, %c0_47, %c0_48] : memref<1x128x256xbf16, #tpu.memory_space<vmem>>, vector<1x128x256xbf16>
    %138 = vector.shape_cast %137 : vector<1x128x256xbf16> to vector<128x256xbf16>
    %cst_49 = arith.constant dense<0.000000e+00> : vector<16x256xf32>
    %139 = tpu.matmul %136, %138, %cst_49 {dimension_numbers = #tpu.dot_dimension_numbers<[1], [0], [0], [1], [0, 0, 1, 1], [], []>} : vector<16x128xbf16>, vector<128x256xbf16>, vector<16x256xf32> -> vector<16x256xf32>
    %c0_50 = arith.constant 0 : index
    %c0_51 = arith.constant 0 : index
    %c0_52 = arith.constant 0 : index
    %140 = vector.load %arg12[%c0_50, %c0_51, %c0_52] : memref<1x1x256xf32, #tpu.memory_space<vmem>>, vector<1x1x256xf32>
    %141 = vector.shape_cast %140 : vector<1x1x256xf32> to vector<1x256xf32>
    %142 = vector.broadcast %141 : vector<1x256xf32> to vector<16x256xf32>
    %143 = arith.addf %139, %142 : vector<16x256xf32>
    %cst_53 = arith.constant 0.000000e+00 : f32
    %144 = vector.broadcast %cst_53 : f32 to vector<16x256xf32>
    %145 = arith.maximumf %143, %144 : vector<16x256xf32>
    %146 = arith.truncf %145 : vector<16x256xf32> to vector<16x256xbf16>
    %c0_54 = arith.constant 0 : index
    %c0_55 = arith.constant 0 : index
    %c0_56 = arith.constant 0 : index
    %147 = vector.load %arg13[%c0_54, %c0_55, %c0_56] : memref<1x256x128xbf16, #tpu.memory_space<vmem>>, vector<1x256x128xbf16>
    %148 = vector.shape_cast %147 : vector<1x256x128xbf16> to vector<256x128xbf16>
    %cst_57 = arith.constant dense<0.000000e+00> : vector<16x128xf32>
    %149 = tpu.matmul %146, %148, %cst_57 {dimension_numbers = #tpu.dot_dimension_numbers<[1], [0], [0], [1], [0, 0, 1, 1], [], []>} : vector<16x256xbf16>, vector<256x128xbf16>, vector<16x128xf32> -> vector<16x128xf32>
    %c0_58 = arith.constant 0 : index
    %c0_59 = arith.constant 0 : index
    %c0_60 = arith.constant 0 : index
    %150 = vector.load %arg14[%c0_58, %c0_59, %c0_60] : memref<1x1x128xf32, #tpu.memory_space<vmem>>, vector<1x1x128xf32>
    %151 = vector.shape_cast %150 : vector<1x1x128xf32> to vector<1x128xf32>
    %152 = vector.broadcast %151 : vector<1x128xf32> to vector<16x128xf32>
    %153 = arith.addf %149, %152 : vector<16x128xf32>
    %154 = arith.addf %135, %153 : vector<16x128xf32>
    %c0_61 = arith.constant 0 : index
    %c0_62 = arith.constant 0 : index
    %c0_63 = arith.constant 0 : index
    %155 = vector.load %arg15[%c0_61, %c0_62, %c0_63] : memref<1x1x128xf32, #tpu.memory_space<vmem>>, vector<1x1x128xf32>
    %156 = vector.shape_cast %155 : vector<1x1x128xf32> to vector<1x128xf32>
    %c0_64 = arith.constant 0 : index
    %c0_65 = arith.constant 0 : index
    %c0_66 = arith.constant 0 : index
    %157 = vector.load %arg16[%c0_64, %c0_65, %c0_66] : memref<1x1x128xf32, #tpu.memory_space<vmem>>, vector<1x1x128xf32>
    %158 = vector.shape_cast %157 : vector<1x1x128xf32> to vector<1x128xf32>
    %cst_67 = arith.constant dense<0.000000e+00> : vector<16xf32>
    %159 = vector.multi_reduction <add>, %154, %cst_67 [1] : vector<16x128xf32> to vector<16xf32>
    %160 = vector.shape_cast %159 : vector<16xf32> to vector<16x1xf32>
    %cst_68 = arith.constant 1.280000e+02 : f32
    %161 = vector.broadcast %cst_68 : f32 to vector<16x1xf32>
    %162 = arith.divf %160, %161 : vector<16x1xf32>
    %163 = vector.broadcast %162 : vector<16x1xf32> to vector<16x128xf32>
    %164 = arith.subf %154, %163 : vector<16x128xf32>
    %165 = arith.mulf %164, %164 : vector<16x128xf32>
    %cst_69 = arith.constant dense<0.000000e+00> : vector<16xf32>
    %166 = vector.multi_reduction <add>, %165, %cst_69 [1] : vector<16x128xf32> to vector<16xf32>
    %167 = vector.shape_cast %166 : vector<16xf32> to vector<16x1xf32>
    %cst_70 = arith.constant 1.280000e+02 : f32
    %168 = vector.broadcast %cst_70 : f32 to vector<16x1xf32>
    %169 = arith.divf %167, %168 : vector<16x1xf32>
    %cst_71 = arith.constant 9.99999974E-6 : f32
    %170 = vector.broadcast %cst_71 : f32 to vector<16x1xf32>
    %171 = arith.addf %169, %170 : vector<16x1xf32>
    %172 = math.rsqrt %171 : vector<16x1xf32>
    %173 = vector.broadcast %172 : vector<16x1xf32> to vector<16x128xf32>
    %174 = arith.mulf %164, %173 : vector<16x128xf32>
    %175 = vector.broadcast %156 : vector<1x128xf32> to vector<16x128xf32>
    %176 = arith.mulf %174, %175 : vector<16x128xf32>
    %177 = vector.broadcast %158 : vector<1x128xf32> to vector<16x128xf32>
    %178 = arith.addf %176, %177 : vector<16x128xf32>
    %179 = vector.shape_cast %178 : vector<16x128xf32> to vector<2x8x128xf32>
    %c0_72 = arith.constant 0 : index
    %c0_73 = arith.constant 0 : index
    %c0_74 = arith.constant 0 : index
    %180 = vector.load %arg19[%c0_72, %c0_73, %c0_74] : memref<2x8x128xf32, #tpu.memory_space<vmem>>, vector<2x8x128xf32>
    tpu.vector_store %arg19[%c0_72, %c0_73, %c0_74], %179 {strides = array<i32>} : memref<2x8x128xf32, #tpu.memory_space<vmem>>, vector<2x8x128xf32>,
    %c1_i32 = arith.constant 1 : i32
    %181 = arith.cmpi eq, %arg0, %c1_i32 : i32
    %182 = arith.extui %181 : i1 to i32
    %c0_i32_75 = arith.constant 0 : i32
    %183 = arith.cmpi ne, %182, %c0_i32_75 : i32
    scf.if %183 {
      %c0_76 = arith.constant 0 : index
      %c0_77 = arith.constant 0 : index
      %184 = vector.load %arg17[%c0_76, %c0_77] : memref<1x128xf32, #tpu.memory_space<vmem>>, vector<1x128xf32>
      %c0_78 = arith.constant 0 : index
      %c0_79 = arith.constant 0 : index
      %185 = vector.load %arg18[%c0_78, %c0_79] : memref<1x128xf32, #tpu.memory_space<vmem>>, vector<1x128xf32>
      %cst_80 = arith.constant dense<0.000000e+00> : vector<16xf32>
      %186 = vector.multi_reduction <add>, %178, %cst_80 [1] : vector<16x128xf32> to vector<16xf32>
      %187 = vector.shape_cast %186 : vector<16xf32> to vector<16x1xf32>
      %cst_81 = arith.constant 1.280000e+02 : f32
      %188 = vector.broadcast %cst_81 : f32 to vector<16x1xf32>
      %189 = arith.divf %187, %188 : vector<16x1xf32>
      %190 = vector.broadcast %189 : vector<16x1xf32> to vector<16x128xf32>
      %191 = arith.subf %178, %190 : vector<16x128xf32>
      %192 = arith.mulf %191, %191 : vector<16x128xf32>
      %cst_82 = arith.constant dense<0.000000e+00> : vector<16xf32>
      %193 = vector.multi_reduction <add>, %192, %cst_82 [1] : vector<16x128xf32> to vector<16xf32>
      %194 = vector.shape_cast %193 : vector<16xf32> to vector<16x1xf32>
      %cst_83 = arith.constant 1.280000e+02 : f32
      %195 = vector.broadcast %cst_83 : f32 to vector<16x1xf32>
      %196 = arith.divf %194, %195 : vector<16x1xf32>
      %cst_84 = arith.constant 9.99999974E-6 : f32
      %197 = vector.broadcast %cst_84 : f32 to vector<16x1xf32>
      %198 = arith.addf %196, %197 : vector<16x1xf32>
      %199 = math.rsqrt %198 : vector<16x1xf32>
      %200 = vector.broadcast %199 : vector<16x1xf32> to vector<16x128xf32>
      %201 = arith.mulf %191, %200 : vector<16x128xf32>
      %202 = vector.broadcast %184 : vector<1x128xf32> to vector<16x128xf32>
      %203 = arith.mulf %201, %202 : vector<16x128xf32>
      %204 = vector.broadcast %185 : vector<1x128xf32> to vector<16x128xf32>
      %205 = arith.addf %203, %204 : vector<16x128xf32>
      %206 = vector.shape_cast %205 : vector<16x128xf32> to vector<2x8x128xf32>
      %c0_85 = arith.constant 0 : index
      %c0_86 = arith.constant 0 : index
      %c0_87 = arith.constant 0 : index
      %207 = vector.load %arg19[%c0_85, %c0_86, %c0_87] : memref<2x8x128xf32, #tpu.memory_space<vmem>>, vector<2x8x128xf32>
      tpu.vector_store %arg19[%c0_85, %c0_86, %c0_87], %206 {strides = array<i32>} : memref<2x8x128xf32, #tpu.memory_space<vmem>>, vector<2x8x128xf32>,
    } else {
    }
    return
  }
  func.func @transform_0(%arg0: i32) -> (i32, i32) {
    %c0_i32 = arith.constant 0 : i32
    %c0_i32_0 = arith.constant 0 : i32
    %c0_i32_1 = arith.constant 0 : i32
    return %c0_i32, %c0_i32_0 : i32, i32
  }
  func.func @transform_1(%arg0: i32) -> (i32, i32, i32) {
    %c0_i32 = arith.constant 0 : i32
    %c0_i32_0 = arith.constant 0 : i32
    %c0_i32_1 = arith.constant 0 : i32
    %c0_i32_2 = arith.constant 0 : i32
    return %c0_i32, %c0_i32_0, %c0_i32_1 : i32, i32, i32
  }
  func.func @transform_2(%arg0: i32) -> (i32, i32) {
    %c0_i32 = arith.constant 0 : i32
    %c0_i32_0 = arith.constant 0 : i32
    %c0_i32_1 = arith.constant 0 : i32
    return %c0_i32, %c0_i32_0 : i32, i32
  }
  func.func @transform_3(%arg0: i32) -> (i32, i32) {
    %c0_i32 = arith.constant 0 : i32
    %c0_i32_0 = arith.constant 0 : i32
    %c0_i32_1 = arith.constant 0 : i32
    return %c0_i32, %c0_i32_0 : i32, i32
  }
  func.func @transform_4(%arg0: i32) -> (i32, i32, i32) {
    %c0_i32 = arith.constant 0 : i32
    %c0_i32_0 = arith.constant 0 : i32
    %c0_i32_1 = arith.constant 0 : i32
    return %arg0, %c0_i32, %c0_i32_0 : i32, i32, i32
  }
  func.func @transform_5(%arg0: i32) -> (i32, i32, i32) {
    %c0_i32 = arith.constant 0 : i32
    %c0_i32_0 = arith.constant 0 : i32
    %c0_i32_1 = arith.constant 0 : i32
    return %arg0, %c0_i32, %c0_i32_0 : i32, i32, i32
  }
  func.func @transform_6(%arg0: i32) -> (i32, i32, i32) {
    %c0_i32 = arith.constant 0 : i32
    %c0_i32_0 = arith.constant 0 : i32
    %c0_i32_1 = arith.constant 0 : i32
    return %arg0, %c0_i32, %c0_i32_0 : i32, i32, i32
  }
  func.func @transform_7(%arg0: i32) -> (i32, i32, i32) {
    %c0_i32 = arith.constant 0 : i32
    %c0_i32_0 = arith.constant 0 : i32
    %c0_i32_1 = arith.constant 0 : i32
    return %arg0, %c0_i32, %c0_i32_0 : i32, i32, i32
  }
  func.func @transform_8(%arg0: i32) -> (i32, i32, i32) {
    %c0_i32 = arith.constant 0 : i32
    %c0_i32_0 = arith.constant 0 : i32
    %c0_i32_1 = arith.constant 0 : i32
    return %arg0, %c0_i32, %c0_i32_0 : i32, i32, i32
  }
  func.func @transform_9(%arg0: i32) -> (i32, i32, i32) {
    %c0_i32 = arith.constant 0 : i32
    %c0_i32_0 = arith.constant 0 : i32
    %c0_i32_1 = arith.constant 0 : i32
    return %arg0, %c0_i32, %c0_i32_0 : i32, i32, i32
  }
  func.func @transform_10(%arg0: i32) -> (i32, i32, i32) {
    %c0_i32 = arith.constant 0 : i32
    %c0_i32_0 = arith.constant 0 : i32
    %c0_i32_1 = arith.constant 0 : i32
    return %arg0, %c0_i32, %c0_i32_0 : i32, i32, i32
  }
  func.func @transform_11(%arg0: i32) -> (i32, i32, i32) {
    %c0_i32 = arith.constant 0 : i32
    %c0_i32_0 = arith.constant 0 : i32
    %c0_i32_1 = arith.constant 0 : i32
    return %arg0, %c0_i32, %c0_i32_0 : i32, i32, i32
  }
  func.func @transform_12(%arg0: i32) -> (i32, i32, i32) {
    %c0_i32 = arith.constant 0 : i32
    %c0_i32_0 = arith.constant 0 : i32
    %c0_i32_1 = arith.constant 0 : i32
    return %arg0, %c0_i32, %c0_i32_0 : i32, i32, i32
  }
  func.func @transform_13(%arg0: i32) -> (i32, i32, i32) {
    %c0_i32 = arith.constant 0 : i32
    %c0_i32_0 = arith.constant 0 : i32
    %c0_i32_1 = arith.constant 0 : i32
    return %arg0, %c0_i32, %c0_i32_0 : i32, i32, i32
  }
  func.func @transform_14(%arg0: i32) -> (i32, i32, i32) {
    %c0_i32 = arith.constant 0 : i32
    %c0_i32_0 = arith.constant 0 : i32
    %c0_i32_1 = arith.constant 0 : i32
    return %arg0, %c0_i32, %c0_i32_0 : i32, i32, i32
  }
  func.func @transform_15(%arg0: i32) -> (i32, i32, i32) {
    %c0_i32 = arith.constant 0 : i32
    %c0_i32_0 = arith.constant 0 : i32
    %c0_i32_1 = arith.constant 0 : i32
    return %arg0, %c0_i32, %c0_i32_0 : i32, i32, i32
  }
  func.func @transform_16(%arg0: i32) -> (i32, i32) {
    %c0_i32 = arith.constant 0 : i32
    %c0_i32_0 = arith.constant 0 : i32
    %c0_i32_1 = arith.constant 0 : i32
    return %c0_i32, %c0_i32_0 : i32, i32
  }
  func.func @transform_17(%arg0: i32) -> (i32, i32) {
    %c0_i32 = arith.constant 0 : i32
    %c0_i32_0 = arith.constant 0 : i32
    %c0_i32_1 = arith.constant 0 : i32
    return %c0_i32, %c0_i32_0 : i32, i32
  }
  func.func @transform_18(%arg0: i32) -> (i32, i32, i32) {
    %c0_i32 = arith.constant 0 : i32
    %c0_i32_0 = arith.constant 0 : i32
    %c0_i32_1 = arith.constant 0 : i32
    %c0_i32_2 = arith.constant 0 : i32
    return %c0_i32, %c0_i32_0, %c0_i32_1 : i32, i32, i32
  }
}

</mosaic_0001>

<bundles_post_ra>
// kernel: tpu_custom_call.1
= control target key start
LH: loop header
LB: loop body
LE: loop exit
PB: predicated region body
PF: predicated region fallthrough
CT: control target
= control target key end

     0   :  { %s4862_s0 = inlined_call_operand.hbm [shape: f32[2,16], index: 0, kind: input, shape index: {}]   ;;  %s4863_s1 = inlined_call_operand.hbm [shape: f32[2,8,128], index: 1, kind: input, shape index: {}]   ;;  %s4864_s2 = inlined_call_operand.hbm [shape: bf16[16,128], index: 2, kind: input, shape index: {}]   ;;  %s4865_s3 = inlined_call_operand.hbm [shape: f32[1,128], index: 3, kind: input, shape index: {}]   ;;  %s4866_s4 = inlined_call_operand.hbm [shape: bf16[2,128,384], index: 4, kind: input, shape index: {}]   ;;  %s4867_s5 = inlined_call_operand.vmem [shape: f32[2,1,384], index: 5, kind: input, shape index: {}]   ;;  %s4868_s6 = inlined_call_operand.hbm [shape: bf16[2,128,128], index: 6, kind: input, shape index: {}]   ;;  %s4869_s7 = inlined_call_operand.vmem [shape: f32[2,1,128], index: 7, kind: input, shape index: {}]   ;;  %s4870_s8 = inlined_call_operand.vmem [shape: f32[2,1,128], index: 8, kind: input, shape index: {}]   ;;  %s4871_s9 = inlined_call_operand.vmem [shape: f32[2,1,128], index: 9, kind: input, shape index: {}]   ;;  %s4872_s10 = inlined_call_operand.hbm [shape: bf16[2,128,256], index: 10, kind: input, shape index: {}]   ;;  %s4873_s11 = inlined_call_operand.vmem [shape: f32[2,1,256], index: 11, kind: input, shape index: {}]   ;;  %s4874_s12 = inlined_call_operand.hbm [shape: bf16[2,256,128], index: 12, kind: input, shape index: {}]   ;;  %s4875_s13 = inlined_call_operand.vmem [shape: f32[2,1,128], index: 13, kind: input, shape index: {}]   ;;  %s4876_s14 = inlined_call_operand.vmem [shape: f32[2,1,128], index: 14, kind: input, shape index: {}]   ;;  %s4877_s15 = inlined_call_operand.vmem [shape: f32[2,1,128], index: 15, kind: input, shape index: {}]   ;;  %s4878_s16 = inlined_call_operand.vmem [shape: f32[1,128], index: 16, kind: input, shape index: {}]   ;;  %s4879_s17 = inlined_call_operand.vmem [shape: f32[1,128], index: 17, kind: input, shape index: {}]   ;;  %s4880_s18 = inlined_call_operand.hbm [shape: f32[2,8,128], index: 18, kind: output, shape index: {}]  }
   0x1   :  { %4907 = sst [smem:[#allocation23_spill]] %s4862_s0 }
   0x2   :  { %4908 = sst [smem:[#allocation24_spill]] %s4863_s1 }
   0x3   :  { %4909 = sst [smem:[#allocation25_spill]] %s4864_s2 }
   0x4   :  { %4910 = sst [smem:[#allocation26_spill]] %s4865_s3 }
   0x5   :  { %4911 = sst [smem:[#allocation27_spill]] %s4866_s4 }
   0x6   :  { %4912 = sst [smem:[#allocation28_spill]] %s4867_s5 }
   0x7   :  { %4913 = sst [smem:[#allocation29_spill]] %s4868_s6 }
   0x8   :  { %4914 = sst [smem:[#allocation30_spill]] %s4871_s9 }
   0x9   :  { %4915 = sst [smem:[#allocation31_spill]] %s4872_s10 }
   0xa   :  { %4916 = sst [smem:[#allocation32_spill]] %s4873_s11 }
   0xb   :  { %4917 = sst [smem:[#allocation33_spill]] %s4875_s13 }
   0xc   :  { %4918 = sst [smem:[#allocation34_spill]] %s4876_s14 }
   0xd   :  { %4919 = sst [smem:[#allocation35_spill]] %s4877_s15 }
   0xe   :  { %4920 = sst [smem:[#allocation36_spill]] %s4878_s16 }
   0xf   :  { %4921 = sst [smem:[#allocation37_spill]] %s4879_s17 }
  0x10   :  { %4922 = sst [smem:[#allocation38_spill]] %s4880_s18 }
  0x11   :  { %23 = vsyncpa [#allocation3], 0 }
  0x12   :  { %24 = vsyncpa [#allocation6], 0 }
  0x13   :  { %25 = vsyncpa [#allocation9], 0 }
  0x14   :  { %26 = vsyncpa [#allocation4], 0  ;;  %s4117_s27 = smov 0   ;;  %s4119_s28 = smov 0  }
  0x15   :  { %s4121_s29 = smov 0   ;;  %s4123_s30 = smov 0  }
  0x16 LB: > { %4923 = sst [smem:[#allocation20_spill]] %s3990_s29  ;;  %s4136_s0 = sadd.s32 4294967295, %s3994_s30   ;;  %s3994_s30 = sphi %s4123_s30, %s4977_s30   ;;  %s3990_s29 = sphi %s4121_s29, %s4979_s29   ;;  %s3986_s28 = sphi %s4119_s28, %s4981_s28   ;;  %s3982_s27 = sphi %s4117_s27, %s4980_s27  }
  0x17   : > { %p136_p0 = scmp.ne.s32.totalorder %s3986_s28, %s3982_s27  ;;  %p4887_p1 = scmp.eq.s32.totalorder %s4136_s0, 0 }
  0x18   : > { %p3076_p2 = scmp.ge.s32.totalorder %s3994_s30, 1  ;;  %p496_p3 = scmp.lt.s32.totalorder %s3994_s30, 3 }
  0x19   : > { %p4145_p5 = por %p4887_p1, %p136_p0  ;;  %s3996_s20 = smov [#allocation2]  }
  0x1a   : > { %p4149_p6 = pnand %p3076_p2, %p496_p3  ;;  %s509_s21 = sshll.u32 %s3996_s20, 4  ;;  %s510_s21 = int_to_ptr.vmem [resolvable:$true] %s509_s21 }
  0x1b   : > { %s4924_s19 = scalar_select %p4145_p5, 1, 0 }
  0x1c   : > { %s4925_s1 = scalar_select %p4149_p6, 1, 0 }
  0x1d   : > { %p3468_p7 = pneg %p4149_p6  ;;  %s4156_s22 = sadd.s32 1, %s3994_s30  }
  0x1e   : > { %4926 = sst [smem:[#allocation21_spill]] %s4156_s22  ;;  %s120_s23 = ssub.s32 %s3994_s30, %s4156_s22 }
  0x1f   : > { %p4160_p8 = pnand %p3468_p7, %p4887_p1  ;;  %p4166_p9 = scmp.eq.s32.totalorder %s120_s23, 0 }
  0x20   : > { %s123_s25 = sadd.s32 1, %s3990_s29  ;;  %s4929_s20 = sld [smem:[#allocation23_spill]] }
  0x21   : > { %s4927_s2 = scalar_select %p4160_p8, 1, 0 }
  0x22   : > { %s4928_s24 = scalar_select %p4166_p9, 1, 0 }
  0x23   : > { %p4181_p12 = pneg %p4160_p8 }
  0x25   : > { %s4930_s15 = scalar_select %p4181_p12, 1, 0 }
  0x26   : > { %s3686_s18 = scalar_lea.hbm %s4929_s20, 32 }
  0x27   : > { %p3687_p11 = scmp.ne.s32.totalorder %s4929_s20, %s3686_s18  ;;  %p3693_p2 = scmp.lt.u32.totalorder %s3686_s18, %s4929_s20 }
  0x29   : > { %p3689_p13 = pnand %p4181_p12, %p3687_p11 }
  0x2b   : > { %p3690_p0 = pneg %p3689_p13 }
  0x2d   : > { %p3695_p3 = pnand %p3693_p2, %p3690_p0 }
  0x2f   : > { %3698 = shalt.err (!%p3695_p3)
}
  0x30   : > { %s3699_s26 = scalar_lea.vmem %s510_s21, 32  ;;  %p3707_p10 = scmp.lt.s32.totalorder %s510_s21, %s510_s21 }
  0x31   : > { %p3700_p7 = scmp.ne.s32.totalorder %s510_s21, %s3699_s26  ;;  %p3708_p5 = scmp.lt.s32.totalorder %s3699_s26, %s3699_s26 }
  0x33   : > { %p3702_p4 = pnand %p3700_p7, %p4181_p12  ;;  %p3709_p6 = por %p3708_p5, %p3707_p10 }
  0x35   : > { %p3703_p1 = pneg %p3702_p4 }
  0x37   : > { %p3710_p9 = pnand %p3709_p6, %p3703_p1 }
  0x39   : > { %3713 = shalt.err (!%p3710_p9)
}
  0x3a   : > { %3471 = dma.hbm_to_vmem [thread:$0]  (!%p4160_p8), %s4929_s20, 32, %s510_s21, [#allocation3]  }
  0x3b   : > { %p4931_p4 = scmp.ne.s32.totalorder %s4928_s24, 0  ;;  %p131_p1 = scmp.eq.s32.totalorder %s3994_s30, 0 }
  0x3c   : > { %p3498_p5 = scmp.lt.s32.totalorder %s3994_s30, 2  ;;  %s563_s22 = sand.u32 1, %s3994_s30  }
  0x3d   : > { %s4200_s18 = scalar_select %p4931_p4, %s3990_s29, %s123_s25  }
  0x3e   : > { %s4206_s27 = sand.u32 1, %s3990_s29   ;;  %p4933_p6 = scmp.ne.s32.totalorder %s3990_s29, %s3986_s28 }
  0x3f   : > { %4932 = sst [smem:[#allocation22_spill]] %s4200_s18  ;;  %s3436_s23 = smul.u32 192, %s4206_s27 }
  0x40   : > { %p132_p9 = por %p131_p1, %p4933_p6  ;;  %s3437_s26 = smul.u32 3072, %s3994_s30 }
  0x41   : > { %s4935_s4 = sld [smem:[#allocation27_spill]]  ;;  %s567_s24 = scalar_lea.vmem [#allocation10], %s3436_s23 }
  0x42   : > { %p4213_p10 = pnand %p3498_p5, %p132_p9  ;;  %s574_s25 = sshll.u32 %s567_s24, 4  ;;  %s4222_s25 = int_to_ptr.vmem [resolvable:$true] %s574_s25 }
  0x43   : > { %s4224_s20 = scalar_lea.sflag [#allocation3], %s563_s22 }
  0x44   : > { %s4934_s16 = scalar_select %p4213_p10, 1, 0 }
  0x45   : > { %p4230_p13 = pneg %p4213_p10 }
  0x47   : > { %s4220_s21 = scalar_lea.hbm %s4935_s4, %s3437_s26  ;;  %s3719_s23 = scalar_lea.hbm %s4935_s4, 6144 }
  0x48   : > { %s3714_s18 = scalar_lea.hbm %s4220_s21, 3072  ;;  %p3720_p3 = scmp.lt.u32.totalorder %s4220_s21, %s4935_s4 }
  0x49   : > { %p3715_p11 = scmp.ne.s32.totalorder %s4220_s21, %s3714_s18  ;;  %p3721_p7 = scmp.lt.u32.totalorder %s3719_s23, %s3714_s18 }
  0x4a   : > { %s4936_s29 = scalar_select %p4230_p13, 1, 0 }
  0x4b   : > { %p3717_p0 = pnand %p4230_p13, %p3715_p11  ;;  %p3722_p4 = por %p3721_p7, %p3720_p3 }
  0x4c   : > { %p3723_p1 = scmp.lt.u32.totalorder %s3714_s18, %s4220_s21 }
  0x4d   : > { %p3718_p2 = pneg %p3717_p0 }
  0x4e   : > { %p3724_p5 = por %p3723_p1, %p3722_p4 }
  0x50   : > { %p3725_p6 = pnand %p3724_p5, %p3718_p2 }
  0x52   : > { %3728 = shalt.err (!%p3725_p6)
}
  0x53   : > { %s3729_s22 = scalar_lea.vmem %s4222_s25, 3072  ;;  %s3997_s14 = smov [#allocation10]  }
  0x54   : > { %p3730_p9 = scmp.ne.s32.totalorder %s4222_s25, %s3729_s22  ;;  %s3734_s26 = sshll.u32 %s3997_s14, 4  ;;  %s3735_s26 = int_to_ptr.vmem [resolvable:$false] %s3734_s26 }
  0x55   : > { %s3736_s17 = scalar_lea.vmem %s3735_s26, 6144  ;;  %p3737_p8 = scmp.lt.s32.totalorder %s4222_s25, %s3735_s26 }
  0x56   : > { %p3732_p11 = pnand %p3730_p9, %p4230_p13  ;;  %p3738_p12 = scmp.lt.s32.totalorder %s3736_s17, %s3729_s22 }
  0x58   : > { %p3733_p0 = pneg %p3732_p11  ;;  %p3739_p3 = por %p3738_p12, %p3737_p8 }
  0x5a   : > { %p3740_p7 = pnand %p3739_p3, %p3733_p0 }
  0x5c   : > { %3743 = shalt.err (!%p3740_p7)
}
  0x5d   : > { %s3998_s18 = smov 192   ;;  %s3999_s23 = smov 12  }
  0x5e   : > { %3484 = dma.hbm_to_vmem [thread:$0]  (!%p4213_p10), %s4220_s21, 3072, %s4222_s25, %s4224_s20, %s3998_s18, %s3998_s18, %s3999_s23  }
  0x5f   : > { %s3083_s24 = sshll.u32 %s4206_s27, 6  ;;  %s3202_s14 = sshll.u32 %s3994_s30, 10 }
  0x60   : > { %s4937_s6 = sld [smem:[#allocation29_spill]]  ;;  %s595_s26 = scalar_lea.vmem [#allocation11], %s3083_s24 }
  0x61   : > { %s602_s17 = sshll.u32 %s595_s26, 4  ;;  %s4000_s11 = smov [#allocation5]   ;;  %s4261_s17 = int_to_ptr.vmem [resolvable:$true] %s602_s17 }
  0x62   : > { %s4263_s5 = sshll.u32 %s4000_s11, 4  ;;  %s520_s5 = int_to_ptr.vmem [resolvable:$true] %s4263_s5 }
  0x66   : > { %s4259_s22 = scalar_lea.hbm %s4937_s6, %s3202_s14  ;;  %s3749_s13 = scalar_lea.hbm %s4937_s6, 2048 }
  0x67   : > { %s3744_s9 = scalar_lea.hbm %s4259_s22, 1024  ;;  %p3750_p4 = scmp.lt.u32.totalorder %s4259_s22, %s4937_s6 }
  0x68   : > { %p3745_p8 = scmp.ne.s32.totalorder %s4259_s22, %s3744_s9  ;;  %p3751_p1 = scmp.lt.u32.totalorder %s3749_s13, %s3744_s9 }
  0x69   : > { %p3753_p6 = scmp.lt.u32.totalorder %s3744_s9, %s4259_s22 }
  0x6a   : > { %p3747_p12 = pnand %p3745_p8, %p4230_p13  ;;  %p3752_p5 = por %p3751_p1, %p3750_p4 }
  0x6c   : > { %p3748_p2 = pneg %p3747_p12  ;;  %p3754_p9 = por %p3753_p6, %p3752_p5 }
  0x6e   : > { %p3755_p11 = pnand %p3754_p9, %p3748_p2 }
  0x70   : > { %3758 = shalt.err (!%p3755_p11)
}
  0x71   : > { %s3759_s11 = scalar_lea.vmem %s4261_s17, 1024  ;;  %s4001_s23 = smov [#allocation11]  }
  0x72   : > { %p3760_p0 = scmp.ne.s32.totalorder %s4261_s17, %s3759_s11  ;;  %s3764_s24 = sshll.u32 %s4001_s23, 4  ;;  %s3765_s24 = int_to_ptr.vmem [resolvable:$false] %s3764_s24 }
  0x73   : > { %s3766_s14 = scalar_lea.vmem %s3765_s24, 2048  ;;  %p3767_p8 = scmp.lt.s32.totalorder %s4261_s17, %s3765_s24 }
  0x74   : > { %p3762_p3 = pnand %p3760_p0, %p4230_p13  ;;  %p3768_p12 = scmp.lt.s32.totalorder %s3766_s14, %s3759_s11 }
  0x76   : > { %p3763_p7 = pneg %p3762_p3  ;;  %p3769_p4 = por %p3768_p12, %p3767_p8 }
  0x78   : > { %p3770_p1 = pnand %p3769_p4, %p3763_p7 }
  0x7a   : > { %3773 = shalt.err (!%p3770_p1)
}
  0x7b   : > { %s4898_s9 = smov 64   ;;  %s4900_s26 = smov 4  }
  0x7c   : > { %3487 = dma.hbm_to_vmem [thread:$0]  (!%p4213_p10), %s4259_s22, 1024, %s4261_s17, %s4224_s20, %s4898_s9, %s4898_s9, %s4900_s26  }
  0x7d   : > { %s4902_s21 = sshll.u32 %s4206_s27, 7  ;;  %s4938_s25 = sld [smem:[#allocation24_spill]] }
  0x7e   : > { %p4939_p5 = scmp.ne.s32.totalorder %s4930_s15, 0 }
  0x83   : > { %s3774_s18 = scalar_lea.hbm %s4938_s25, 256 }
  0x84   : > { %p3775_p2 = scmp.ne.s32.totalorder %s4938_s25, %s3774_s18  ;;  %p3781_p11 = scmp.lt.u32.totalorder %s3774_s18, %s4938_s25 }
  0x86   : > { %p3777_p6 = pnand %p3775_p2, %p4939_p5 }
  0x88   : > { %p3778_p9 = pneg %p3777_p6 }
  0x8a   : > { %p3783_p0 = pnand %p3781_p11, %p3778_p9 }
  0x8c   : > { %3786 = shalt.err (!%p3783_p0)
}
  0x8d   : > { %s3787_s22 = scalar_lea.vmem %s520_s5, 256  ;;  %p3795_p12 = scmp.lt.s32.totalorder %s520_s5, %s520_s5 }
  0x8e   : > { %p3788_p3 = scmp.ne.s32.totalorder %s520_s5, %s3787_s22  ;;  %p3796_p4 = scmp.lt.s32.totalorder %s3787_s22, %s3787_s22 }
  0x90   : > { %p3790_p7 = pnand %p3788_p3, %p4939_p5  ;;  %p3797_p1 = por %p3796_p4, %p3795_p12 }
  0x92   : > { %p3791_p8 = pneg %p3790_p7 }
  0x94   : > { %p3798_p10 = pnand %p3797_p1, %p3791_p8 }
  0x96   : > { %3801 = shalt.err (!%p3798_p10)
}
  0x97   : > { %s4004_s17 = smov 128   ;;  %s4005_s4 = smov 8  }
  0x98   : > { %p4940_p2 = scmp.ne.s32.totalorder %s4927_s2, 0  ;;  %s4903_s11 = sshll.u32 %s3994_s30, 11 }
  0x99   : > { %s4941_s10 = sld [smem:[#allocation31_spill]]  ;;  %s634_s22 = scalar_lea.vmem [#allocation12], %s4902_s21 }
  0x9a   : > { %3474 = dma.hbm_to_vmem [thread:$0]  (!%p4940_p2), %s4938_s25, 256, %s520_s5, [#allocation6], %s4004_s17, %s4004_s17, %s4005_s4  }
  0x9b   : > { %s641_s9 = sshll.u32 %s634_s22, 4  ;;  %s4323_s9 = int_to_ptr.vmem [resolvable:$true] %s641_s9 }
  0x9f   : > { %s4319_s14 = scalar_lea.hbm %s4941_s10, %s4903_s11  ;;  %s3807_s18 = scalar_lea.hbm %s4941_s10, 4096 }
  0xa0   : > { %s3802_s26 = scalar_lea.hbm %s4319_s14, 2048  ;;  %p3808_p11 = scmp.lt.u32.totalorder %s4319_s14, %s4941_s10 }
  0xa1   : > { %p3803_p10 = scmp.ne.s32.totalorder %s4319_s14, %s3802_s26  ;;  %p3809_p0 = scmp.lt.u32.totalorder %s3807_s18, %s3802_s26 }
  0xa2   : > { %p3811_p7 = scmp.lt.u32.totalorder %s3802_s26, %s4319_s14 }
  0xa3   : > { %p3805_p6 = pnand %p3803_p10, %p4230_p13  ;;  %p3810_p3 = por %p3809_p0, %p3808_p11 }
  0xa5   : > { %p3806_p9 = pneg %p3805_p6  ;;  %p3812_p8 = por %p3811_p7, %p3810_p3 }
  0xa7   : > { %p3813_p12 = pnand %p3812_p8, %p3806_p9 }
  0xa9   : > { %3816 = shalt.err (!%p3813_p12)
}
  0xaa   : > { %s3817_s22 = scalar_lea.vmem %s4323_s9, 2048  ;;  %s4006_s5 = smov [#allocation12]  }
  0xab   : > { %p3818_p4 = scmp.ne.s32.totalorder %s4323_s9, %s3817_s22  ;;  %s3822_s13 = sshll.u32 %s4006_s5, 4  ;;  %s3823_s13 = int_to_ptr.vmem [resolvable:$false] %s3822_s13 }
  0xac   : > { %s3824_s23 = scalar_lea.vmem %s3823_s13, 4096  ;;  %p3825_p6 = scmp.lt.s32.totalorder %s4323_s9, %s3823_s13 }
  0xad   : > { %p3820_p1 = pnand %p3818_p4, %p4230_p13  ;;  %p3826_p2 = scmp.lt.s32.totalorder %s3824_s23, %s3817_s22 }
  0xaf   : > { %p3821_p10 = pneg %p3820_p1  ;;  %p3827_p11 = por %p3826_p2, %p3825_p6 }
  0xb1   : > { %p3828_p0 = pnand %p3827_p11, %p3821_p10 }
  0xb3   : > { %3831 = shalt.err (!%p3828_p0)
}
  0xb4   : > { %p4942_p9 = scmp.ne.s32.totalorder %s4934_s16, 0  ;;  %s4007_s26 = smov [#allocation7]  }
  0xb5   : > { %s532_s18 = sshll.u32 %s4007_s26, 4  ;;  %s4008_s24 = smov [#allocation8]   ;;  %s533_s18 = int_to_ptr.vmem [resolvable:$true] %s532_s18 }
  0xb6   : > { %3490 = dma.hbm_to_vmem [thread:$0]  (!%p4942_p9), %s4319_s14, 2048, %s4323_s9, %s4224_s20, %s4004_s17, %s4004_s17, %s4005_s4  }
  0xb7   : > { %s546_s5 = sshll.u32 %s4008_s24, 4  ;;  %s4943_s23 = sld [smem:[#allocation25_spill]]  ;;  %s547_s5 = int_to_ptr.vmem [resolvable:$true] %s546_s5 }
  0xbd   : > { %s3832_s21 = scalar_lea.hbm %s4943_s23, 128 }
  0xbe   : > { %p3833_p2 = scmp.ne.s32.totalorder %s4943_s23, %s3832_s21  ;;  %p3839_p8 = scmp.lt.u32.totalorder %s3832_s21, %s4943_s23 }
  0xc0   : > { %p3835_p3 = pnand %p3833_p2, %p4939_p5 }
  0xc2   : > { %p3836_p7 = pneg %p3835_p3 }
  0xc4   : > { %p3841_p12 = pnand %p3839_p8, %p3836_p7 }
  0xc6   : > { %3844 = shalt.err (!%p3841_p12)
}
  0xc7   : > { %s3845_s9 = scalar_lea.vmem %s533_s18, 128  ;;  %p3853_p6 = scmp.lt.s32.totalorder %s533_s18, %s533_s18 }
  0xc8   : > { %p3846_p4 = scmp.ne.s32.totalorder %s533_s18, %s3845_s9  ;;  %p3854_p11 = scmp.lt.s32.totalorder %s3845_s9, %s3845_s9 }
  0xca   : > { %p3848_p1 = pnand %p3846_p4, %p4939_p5  ;;  %p3855_p0 = por %p3854_p11, %p3853_p6 }
  0xcc   : > { %p3849_p10 = pneg %p3848_p1 }
  0xce   : > { %p3856_p9 = pnand %p3855_p0, %p3849_p10 }
  0xd0   : > { %3859 = shalt.err (!%p3856_p9)
}
  0xd1   : > { %p4944_p2 = scmp.ne.s32.totalorder %s4927_s2, 0  ;;  %s4945_s6 = smov 4  }
  0xd2   : > { %s4946_s17 = smov 64   ;;  %s4947_s3 = sld [smem:[#allocation26_spill]] }
  0xd3   : > { %3477 = dma.hbm_to_vmem [thread:$0]  (!%p4944_p2), %s4943_s23, 128, %s533_s18, [#allocation6], %s4946_s17, %s4946_s17, %s4945_s6  }
  0xd8   : > { %s3860_s11 = scalar_lea.hbm %s4947_s3, 16 }
  0xd9   : > { %p3861_p3 = scmp.ne.s32.totalorder %s4947_s3, %s3860_s11  ;;  %p3867_p8 = scmp.lt.u32.totalorder %s3860_s11, %s4947_s3 }
  0xdb   : > { %p3863_p9 = pnand %p3861_p3, %p4939_p5 }
  0xdd   : > { %p3864_p7 = pneg %p3863_p9 }
  0xdf   : > { %p3869_p12 = pnand %p3867_p8, %p3864_p7 }
  0xe1   : > { %3872 = shalt.err (!%p3869_p12)
}
  0xe2   : > { %s3873_s22 = scalar_lea.vmem %s547_s5, 16  ;;  %s3880_s18 = scalar_lea.vmem %s547_s5, 32 }
  0xe3   : > { %p3874_p4 = scmp.ne.s32.totalorder %s547_s5, %s3873_s22  ;;  %p3881_p6 = scmp.lt.s32.totalorder %s547_s5, %s547_s5 }
  0xe4   : > { %p3882_p11 = scmp.lt.s32.totalorder %s3880_s18, %s3873_s22 }
  0xe5   : > { %p3876_p1 = pnand %p3874_p4, %p4939_p5 }
  0xe6   : > { %p3883_p0 = por %p3882_p11, %p3881_p6 }
  0xe7   : > { %p3877_p10 = pneg %p3876_p1 }
  0xe9   : > { %p3884_p13 = pnand %p3883_p0, %p3877_p10 }
  0xeb   : > { %3887 = shalt.err (!%p3884_p13)
}
  0xec   : > { %3480 = dma.hbm_to_vmem [thread:$0]  (!%p4944_p2), %s4947_s3, 16, %s547_s5, [#allocation9]  }
  0xed   : > { %s4948_s21 = sshll.u32 %s3994_s30, 11  ;;  %s4949_s11 = sshll.u32 %s4206_s27, 7 }
  0xee   : > { %s4394_s4 = scalar_lea.hbm %s4874_s12, %s4948_s21  ;;  %s662_s14 = scalar_lea.vmem [#allocation13], %s4949_s11 }
  0xef   : > { %s669_s2 = sshll.u32 %s662_s14, 4  ;;  %s3888_s26 = scalar_lea.hbm %s4394_s4, 2048  ;;  %s4398_s2 = int_to_ptr.vmem [resolvable:$true] %s669_s2 }
  0xf0   : > { %p3889_p13 = scmp.ne.s32.totalorder %s4394_s4, %s3888_s26  ;;  %p4950_p5 = scmp.ne.s32.totalorder %s4936_s29, 0 }
  0xf1   : > { %s3893_s24 = scalar_lea.hbm %s4874_s12, 4096  ;;  %p3894_p9 = scmp.lt.u32.totalorder %s4394_s4, %s4874_s12 }
  0xf2   : > { %p3891_p3 = pnand %p3889_p13, %p4950_p5  ;;  %p3895_p7 = scmp.lt.u32.totalorder %s3893_s24, %s3888_s26 }
  0xf3   : > { %p3897_p12 = scmp.lt.u32.totalorder %s3888_s26, %s4394_s4 }
  0xf4   : > { %p3892_p2 = pneg %p3891_p3  ;;  %p3896_p8 = por %p3895_p7, %p3894_p9 }
  0xf6   : > { %p3898_p4 = por %p3897_p12, %p3896_p8 }
  0xf8   : > { %p3899_p1 = pnand %p3898_p4, %p3892_p2 }
  0xfa   : > { %3902 = shalt.err (!%p3899_p1)
}
  0xfb   : > { %s3903_s27 = scalar_lea.vmem %s4398_s2, 2048  ;;  %s4009_s18 = smov [#allocation13]  }
  0xfc   : > { %p3904_p10 = scmp.ne.s32.totalorder %s4398_s2, %s3903_s27  ;;  %s3908_s9 = sshll.u32 %s4009_s18, 4  ;;  %s3909_s9 = int_to_ptr.vmem [resolvable:$false] %s3908_s9 }
  0xfd   : > { %s3910_s10 = scalar_lea.vmem %s3909_s9, 4096  ;;  %p3911_p0 = scmp.lt.s32.totalorder %s4398_s2, %s3909_s9 }
  0xfe   : > { %p3906_p6 = pnand %p3904_p10, %p4950_p5  ;;  %p3912_p13 = scmp.lt.s32.totalorder %s3910_s10, %s3903_s27 }
 0x100   : > { %p3907_p11 = pneg %p3906_p6  ;;  %p3913_p3 = por %p3912_p13, %p3911_p0 }
 0x102   : > { %p3914_p9 = pnand %p3913_p3, %p3907_p11 }
 0x104   : > { %3917 = shalt.err (!%p3914_p9)
}
 0x105   : > { %p4951_p2 = scmp.ne.s32.totalorder %s4934_s16, 0  ;;  %p4952_p5 = scmp.ne.s32.totalorder %s4925_s1, 0 }
 0x106   : > { %p4953_p7 = scmp.eq.s32.totalorder (!%p4952_p5), %s4136_s0, 0 }
 0x107   : > { %3493 = dma.hbm_to_vmem [thread:$0]  (!%p4951_p2), %s4394_s4, 2048, %s4398_s2, %s4224_s20, %s4946_s17, %s4946_s17, %s4945_s6  }
 0x108   : > { %699 = sbr.rel (%p4952_p5) target bundleno = 5206 (0x1456), region = 92 }
 0x10f   : > { %3961 = dma.done.wait (%p4953_p7), [#allocation3], 32   ;;  %p4954_p8 = pmov %p4953_p7 }
 0x110   : > { %p4955_p12 = pmov %p4953_p7 }
 0x111   : > { %3963 = vsyncadd (%p4954_p8), [#allocation3], 4294967264 }
 0x112   : > { %3965 = dma.done.wait (%p4955_p12), [#allocation6], 384   ;;  %p4956_p4 = pmov %p4953_p7 }
 0x114   : > { %3967 = vsyncadd (%p4956_p4), [#allocation6], 4294966912  ;;  %p4957_p1 = pmov %p4956_p4 }
 0x116   : > { %3969 = dma.done.wait (%p4957_p1), [#allocation9], 16   ;;  %p4958_p10 = pmov %p4957_p1 }
 0x117   : > { %s717_s29 = sand.u32 1, %s4136_s0   ;;  %s719_s1 = sand.u32 1, %s3986_s28  }
 0x118   : > { %3971 = vsyncadd (%p4958_p10), [#allocation9], 4294967280  ;;  %s3438_s20 = smul.u32 192, %s719_s1  ;;  %s718_s16 = scalar_lea.sflag [#allocation3], %s717_s29 }
 0x119   : > { %p4959_p6 = scmp.ne.s32.totalorder %s4924_s19, 0 }
 0x11a   : > { %s4441_s6 = scalar_lea.vmem [#allocation10], %s3438_s20 }
 0x11b   : > { %3973 = dma.done.wait (%p4959_p6), %s718_s16, 8192  }
 0x11c   : > { %3975 = vsyncadd (%p4959_p6), %s718_s16, 4294959104  ;;  %s3097_s17 = sshll.u32 %s719_s1, 6  ;;  %s3098_s21 = sshll.u32 %s719_s1, 7 }
 0x11d   : > { %p837_p11 = scmp.lt.s32.totalorder %s4136_s0, 1  ;;  %s4961_s18 = sld [smem:[#allocation28_spill]] }
 0x11e   : > { %s4962_s20 = sld [smem:[#allocation32_spill]]  ;;  %s4963_s19 = sld [smem:[#allocation33_spill]] }
 0x11f   : > { %s4449_s25 = scalar_select %p837_p11, %s4136_s0, 1 }
 0x120   : > { %s4964_s3 = sld [smem:[#allocation34_spill]]  ;;  %s4965_s13 = sld [smem:[#allocation35_spill]] }
 0x121   : > { %s3439_s15 = smul.u32 3, %s4449_s25  ;;  %s3100_s10 = sshll.u32 %s4449_s25, 1 }
 0x122   : > { %s4489_s27 = scalar_lea.vmem [#allocation12], %s3098_s21  ;;  %p4966_p0 = scmp.ne.s32.totalorder %s4136_s0, 0 }
 0x123   : > { %s4467_s9 = scalar_lea.vmem %s4961_s18, %s3439_s15  ;;  %s4487_s15 = scalar_lea.vmem [#allocation11], %s3097_s17  ;;  %v3559_v0 = vld [vmem:[#allocation7] sm:$0xff] (!%p4966_p0)   ;;  %v4010_v1 = vmov (!%p4966_p0), 0.0   ;;  %v868_v2 = vld [vmem:[#allocation2] sm:$0x3] (!%p4966_p0)  ;;  %vm4011_vm0 = vmmov (!%p4966_p0), 0   ;;  %v936_v10 = vlaneseq (!%p4966_p0) }
 0x124   : > { %s4473_s16 = scalar_lea.vmem %s4962_s20, %s3100_s10  ;;  %s856_s14 = scalar_lea.vmem %s4963_s19, %s4449_s25  ;;  %3282 = vmatprep.subr.bf16.mxu0 (!%p4966_p0), %v4010_v1  ;;  %3284 = vmatprep.mubr.msk.bf16.mxu0 (!%p4966_p0), %vm4011_vm0, %v4010_v1  ;;  %v869_v3 = vpack.c.bf16 (!%p4966_p0), %v868_v2, %v868_v2  ;;  %vm885_vm1 = vcmask (!%p4966_p0), 130048   ;;  %v3102_v4 = vld [vmem:[#allocation8] ss:$0 sm:$0xff] (!%p4966_p0)  ;;  %v4012_v8 = vmov (!%p4966_p0), 1966171168   ;;  %v930_v21 = vld [vmem:[#allocation5] sm:$0xff] (!%p4966_p0) }
 0x125   : > { %s4491_s18 = scalar_lea.vmem [#allocation13], %s3098_s21  ;;  %867 = sbr.rel (%p4966_p0) target bundleno = 532 (0x214), region = 128  ;;  %3283 = vmatpush3.bf16.msra.mxu0 (!%p4966_p0), %v3559_v0  ;;  %v934_v9 = vunpack.c.l.s4 (!%p4966_p0), %v4012_v8  ;;  %v937_v14 = vshrl.u32 (!%p4966_p0), %v936_v10, 7  ;;  %v931_v24 = vld [vmem:[#allocation5 + $0x8] sm:$0xff] (!%p4966_p0) }
 0x126   : > { %s859_s30 = scalar_lea.vmem %s4964_s3, %s4449_s25  ;;  %s862_s22 = scalar_lea.vmem %s4965_s13, %s4449_s25 }
 0x127   : > { %v935_v13 = vunpack.c.0.s8 (!%p4966_p0), %v934_v9  ;;  %v957_v18 = vsub.s32 (!%p4966_p0), 0, %v937_v14 }
 0x128   : > { %3285 = vmatmul.mubr.msk.bf16.vlgmr.msra.gmra.mrb[0].mxu0 (!%p4966_p0), %vm885_vm1, %v869_v3 }
 0x129   : > { %v938_v15 = vsub.s32 (!%p4966_p0), %v935_v13, %v937_v14 }
 0x1fb   : > { %v923_v5 = vpop.f32.mrb[0].mxu0 }
 0x1fc   : > { %v924_v6 = vadd.f32 %v3102_v4, %v923_v5  ;;  %v3286_v7 = vpop.f32.mrb[1].mxu0 }
 0x1fd   : > { %v926_v11 = vpop.f32.mrb[2].mxu0 }
 0x1fe   : > { %3560 = vtanh.f32 %v924_v6  ;;  %v3287_v12 = vpop.f32.mrb[3].mxu0 }
 0x208   : > { %v3561_v16 = vpop.eup %3560 }
 0x209   : > { %v939_v17 = vrot.slane %v3561_v16, %v938_v15 }
 0x20b   : > { %v940_v19 = vcombine.high %v939_v17, %v939_v17  ;;  %v947_v20 = vrot.slane %v939_v17, %v938_v15 }
 0x20d   : > { %v954_v22 = vrot.slane %v940_v19, %v938_v15  ;;  %v958_v23 = vrot.slane %v947_v20, %v957_v18 }
 0x20f   : > { %v962_v25 = vrot.slane %v954_v22, %v957_v18  ;;  %v965_v26 = vadd.f32 %v958_v23, %v930_v21 }
 0x211   : > { %v966_v27 = vadd.f32 %v962_v25, %v931_v24  ;;  %967 = vst [vmem:[#allocation14] sm:$0xff] %v965_v26 }
 0x213   : > { %968 = vst [vmem:[#allocation14 + $0x8] sm:$0xff] %v966_v27 }
 0x214 PF: > { %v3562_v28 = vld [vmem:[%s4441_s6 + $0x4] ss:$12 sps:$4 sm:$0xff]   ;;  %v3564_v29 = vld [vmem:[%s4441_s6] ss:$12 sps:$4 sm:$0xff]   ;;  %v4013_v30 = vmov 0   ;;  %v4014_v31 = vmov 0.0   ;;  %v1006_v57 = vlaneseq  ;;  %s4967_s26 = scalar_lea.vmem %s4869_s7, %s4449_s25  ;;  %s4968_s10 = scalar_lea.vmem %s4870_s8, %s4449_s25 }
 0x215   : > { %1181 = vmatprep.mubr.bf16.mxu0 %v4013_v30  ;;  %3288 = vmatprep.subr.bf16.mxu1 %v4014_v31  ;;  %v3565_v32 = vld [vmem:[%s4441_s6 + $0x1c] ss:$12 sps:$4 sm:$0xff]   ;;  %v3567_v33 = vld [vmem:[%s4441_s6 + $0x18] ss:$12 sps:$4 sm:$0xff]   ;;  %v3568_v34 = vld [vmem:[%s4441_s6 + $0x34] ss:$12 sps:$4 sm:$0xff]  }
 0x216   : > { %1149 = vmatprep.subr.bf16.mxu0 %v3562_v28  ;;  %v3570_v35 = vld [vmem:[%s4441_s6 + $0x30] ss:$12 sps:$4 sm:$0xff]   ;;  %v3571_v36 = vld [vmem:[%s4441_s6 + $0x4c] ss:$12 sps:$4 sm:$0xff]   ;;  %v3573_v37 = vld [vmem:[%s4441_s6 + $0x48] ss:$12 sps:$4 sm:$0xff]  }
 0x217   : > { %1150 = vmatpush1.bf16.msra.mxu0 %v3564_v29  ;;  %v3574_v38 = vld [vmem:[%s4441_s6 + $0x64] ss:$12 sps:$4 sm:$0xff]   ;;  %v3586_v39 = vld [vmem:[%s4441_s6 + $0x8] ss:$12 sps:$4 sm:$0xff]   ;;  %v3587_v40 = vld [vmem:[%s4441_s6 + $0x20] ss:$12 sps:$4 sm:$0xff]  }
 0x218   : > { %1151 = vmatprep.subr.bf16.mxu0 %v3565_v32  ;;  %3289 = vmatpush3.bf16.msra.mxu1 %v3586_v39  ;;  %v3576_v41 = vld [vmem:[%s4441_s6 + $0x60] ss:$12 sps:$4 sm:$0xff]   ;;  %v3577_v42 = vld [vmem:[%s4441_s6 + $0x7c] ss:$12 sps:$4 sm:$0xff]   ;;  %v3579_v43 = vld [vmem:[%s4441_s6 + $0x78] ss:$12 sps:$4 sm:$0xff]  }
 0x219   : > { %3290 = vmatprep.subr.bf16.mxu1 %v4014_v31  ;;  %v3580_v44 = vld [vmem:[%s4441_s6 + $0x94] ss:$12 sps:$4 sm:$0xff]   ;;  %v3588_v45 = vld [vmem:[%s4441_s6 + $0x38] ss:$12 sps:$4 sm:$0xff]   ;;  %v3589_v46 = vld [vmem:[%s4441_s6 + $0x50] ss:$12 sps:$4 sm:$0xff]  }
 0x21a   : > { %v3582_v47 = vld [vmem:[%s4441_s6 + $0x90] ss:$12 sps:$4 sm:$0xff]   ;;  %v3583_v48 = vld [vmem:[%s4441_s6 + $0xac] ss:$12 sps:$4 sm:$0xff]   ;;  %v3590_v49 = vld [vmem:[%s4441_s6 + $0x68] ss:$12 sps:$4 sm:$0xff]  }
 0x21b   : > { %1152 = vmatpush1.bf16.msra.mxu0 %v3567_v33  ;;  %v3585_v50 = vld [vmem:[%s4441_s6 + $0xa8] ss:$12 sps:$4 sm:$0xff]   ;;  %v4521_v51 = vld [vmem:[#allocation14] sm:$0xff]  ;;  %v3593_v56 = vld [vmem:[%s4441_s6 + $0xb0] ss:$12 sps:$4 sm:$0xff]   ;;  %vm4015_vm2 = vmmov 0  }
 0x21c   : > { %1153 = vmatprep.subr.bf16.mxu0 %v3568_v34  ;;  %3291 = vmatpush3.bf16.msra.mxu1 %v3587_v40  ;;  %v4523_v52 = vld [vmem:[#allocation14 + $0x8] sm:$0xff]  ;;  %v3592_v55 = vld [vmem:[%s4441_s6 + $0x98] ss:$12 sps:$4 sm:$0xff]   ;;  %v4542_v58 = vshrl.u32 %v1006_v57, 7  ;;  %v1004_v60 = vld [vmem:[%s4467_s9] sm:$0x7] }
 0x21d   : > { %3292 = vmatprep.subr.bf16.mxu1 %v4014_v31  ;;  %v3591_v53 = vld [vmem:[%s4441_s6 + $0x80] ss:$12 sps:$4 sm:$0xff]   ;;  %v971_v54 = vpack.c.bf16 %v4523_v52, %v4521_v51  ;;  %3304 = vmatprep.mubr.msk.bf16.mxu1 %vm4015_vm2, %v4014_v31  ;;  %vm1256_vm3 = vcmask 261120   ;;  %s4016_s3 = smov 96   ;;  %vm1377_vm4 = vcmask 1043456   ;;  %vm1349_vm5 = vcmask 64512  }
 0x21e   : > { %v1012_v59 = vsub.s32 1, %v4542_v58  ;;  %v1008_v62 = vsub.s32 0, %v4542_v58  ;;  %v1016_v14 = vsub.s32 2, %v4542_v58  ;;  %s4017_s6 = smov 64   ;;  %s4018_s17 = smov 32  }
 0x21f   : > { %1154 = vmatpush1.bf16.msra.mxu0 %v3570_v35  ;;  %s4969_s20 = sld [smem:[#allocation30_spill]]  ;;  %v3176_v58 = vld [vmem:[%s856_s14] ss:$0 sm:$0xff]  ;;  %p3195_p13 = scmp.ne.s32.totalorder %s4136_s0, 1 }
 0x220   : > { %1155 = vmatprep.subr.bf16.mxu0 %v3571_v36  ;;  %3293 = vmatpush3.bf16.msra.mxu1 %v3588_v45  ;;  %v1013_v61 = vrot.slane %v1004_v60, %v1012_v59  ;;  %v1009_v4 = vrot.slane %v1004_v60, %v1008_v62  ;;  %v1017_v15 = vrot.slane %v1004_v60, %v1016_v14 }
 0x221   : > { %3294 = vmatprep.subr.bf16.mxu1 %v4014_v31 }
 0x223   : > { %1156 = vmatpush1.bf16.msra.mxu0 %v3573_v37 }
 0x224   : > { %1157 = vmatprep.subr.bf16.mxu0 %v3574_v38  ;;  %3295 = vmatpush3.bf16.msra.mxu1 %v3589_v46 }
 0x225   : > { %3296 = vmatprep.subr.bf16.mxu1 %v4014_v31  ;;  %s4970_s4 = scalar_lea.vmem %s4969_s20, %s4449_s25 }
 0x227   : > { %1158 = vmatpush1.bf16.msra.mxu0 %v3576_v41 }
 0x228   : > { %1159 = vmatprep.subr.bf16.mxu0 %v3577_v42  ;;  %3297 = vmatpush3.bf16.msra.mxu1 %v3590_v49 }
 0x229   : > { %3298 = vmatprep.subr.bf16.mxu1 %v4014_v31 }
 0x22b   : > { %1160 = vmatpush1.bf16.msra.mxu0 %v3579_v43 }
 0x22c   : > { %1161 = vmatprep.subr.bf16.mxu0 %v3580_v44  ;;  %3299 = vmatpush3.bf16.msra.mxu1 %v3591_v53 }
 0x22d   : > { %3300 = vmatprep.subr.bf16.mxu1 %v4014_v31 }
 0x22f   : > { %1162 = vmatpush1.bf16.msra.mxu0 %v3582_v47 }
 0x230   : > { %1163 = vmatprep.subr.bf16.mxu0 %v3583_v48  ;;  %3301 = vmatpush3.bf16.msra.mxu1 %v3592_v55 }
 0x231   : > { %3302 = vmatprep.subr.bf16.mxu1 %v4014_v31 }
 0x233   : > { %1164 = vmatpush1.bf16.msra.mxu0 %v3585_v50 }
 0x234   : > { %3308 = vmatprep.subr.bf16.mxu0 %v4014_v31  ;;  %3303 = vmatpush3.bf16.msra.mxu1 %v3593_v56 }
 0x235   : > { %3314 = vmatprep.subr.bf16.mxu1 %v4014_v31 }
 0x236   : > { %1182 = vmatmul.mubr.bf16.vlgmr.msra.gmra.mrb[0].mxu0 %v971_v54 }
 0x237   : > { %3310 = vmatprep.mubr.msk.bf16.mxu0 %vm4015_vm2, %v4014_v31  ;;  %3305 = vmatmul.mubr.bf16.vlgmr.msra.gmra.mrb[0].mxu1 %v971_v54 }
 0x238   : > { %3316 = vmatprep.mubr.msk.bf16.mxu1 %vm4015_vm2, %v4014_v31 }
 0x309   : > { %v1183_v63 = vpop.f32.mrb[0].mxu0 }
 0x30a   : > { %v1185_v0 = vpop.f32.mrb[1].mxu0  ;;  %v1184_v9 = vadd.f32 %v1183_v63, %v1009_v4  ;;  %v1226_v16 = vpop.f32.mrb[0].mxu1 }
 0x30b   : > { %v1186_v1 = vadd.f32 %v1185_v0, %v1013_v61  ;;  %v1187_v2 = vpop.f32.mrb[2].mxu0  ;;  %v1227_v17 = vadd.f32 %v1226_v16, %v1017_v15  ;;  %v3306_v18 = vpop.f32.mrb[1].mxu1 }
 0x30c   : > { %v1189_v3 = vpop.f32.mrb[3].mxu0  ;;  %v1188_v11 = vadd.f32 %v1187_v2, %v1009_v4  ;;  %v4563_v12 = vpack.c.bf16 %v1184_v9, %v1184_v9  ;;  %v1229_v19 = vpop.f32.mrb[2].mxu1 }
 0x30d   : > { %v4551_v5 = vpack.c.bf16 %v1186_v1, %v1186_v1  ;;  %v1190_v6 = vadd.f32 %v1189_v3, %v1013_v61  ;;  %v1230_v20 = vadd.f32 %v1229_v19, %v1017_v15  ;;  %v3307_v21 = vpop.f32.mrb[3].mxu1  ;;  %v4576_v22 = vpack.c.bf16 %v1227_v17, %v1227_v17 }
 0x30e   : > { %v4565_v13 = vpack.c.bf16 %v1188_v11, %v1188_v11 }
 0x30f   : > { %v4553_v7 = vpack.c.bf16 %v1190_v6, %v1190_v6  ;;  %v1261_v8 = vsel %vm1256_vm3, %v4551_v5, 0  ;;  %v4578_v23 = vpack.c.bf16 %v1230_v20, %v1230_v20  ;;  %v1379_v24 = vsel %vm1377_vm4, %v4576_v22, 0 }
 0x310   : > { %3309 = vmatpush3.bf16.xpose.msra.mxu0 %v1261_v8 }
 0x311   : > { %1524 = vrot.lane.b32.xlu1 %v4553_v7, %s4016_s3  ;;  %v1307_v10 = vsel %vm1256_vm3, %v4553_v7, 0  ;;  %3320 = vmatprep.subr.bf16.mxu0 %v4014_v31  ;;  %v1425_v25 = vsel %vm1377_vm4, %v4578_v23, 0 }
 0x312   : > { %3315 = vmatpush3.bf16.xpose.msra.mxu1 %v1307_v10 }
 0x313   : > { %3326 = vmatprep.subr.bf16.mxu1 %v4014_v31 }
 0x317   : > { %3311 = vmatmul.mubr.msk.bf16.vlgmr.msra.gmra.mrb[4].mxu0 %vm1256_vm3, %v4563_v12 }
 0x318   : > { %3322 = vmatprep.mubr.msk.bf16.mxu0 %vm4015_vm2, %v4014_v31  ;;  %3321 = vmatpush3.bf16.msra.mxu0 %v1379_v24 }
 0x319   : > { %3317 = vmatmul.mubr.msk.bf16.vlgmr.msra.gmra.mrb[4].mxu1 %vm1256_vm3, %v4565_v13  ;;  %3332 = vmatprep.subr.bf16.mxu0 %v4014_v31 }
 0x31a   : > { %3328 = vmatprep.mubr.msk.bf16.mxu1 %vm4015_vm2, %v4014_v31  ;;  %3327 = vmatpush3.bf16.msra.mxu1 %v1425_v25 }
 0x31b   : > { %3338 = vmatprep.subr.bf16.mxu1 %v4014_v31 }
 0x383   : > { %v1525_v48 = vpop.permute.xlu1 %1524 }
 0x384   : > { %v1530_v0 = vsel %vm1256_vm3, %v1525_v48, 0  ;;  %v3596_v48 = vld [vmem:[%s4487_s15 + $0x10] sm:$0xff]  }
 0x3ea   : > { %v1297_v26 = vpop.f32.mrb[4].mxu0 }
 0x3eb   : > { %v3312_v27 = vpop.f32.mrb[5].mxu0  ;;  %v1350_v28 = vsel %vm1349_vm5, %v1297_v26, -inf }
 0x3ec   : > { %v1343_v29 = vpop.f32.mrb[4].mxu1  ;;  %1351 = vmax.xlane.f32.xlu0 %v1350_v28  ;;  %v1300_v32 = vpop.f32.mrb[6].mxu0 }
 0x3ed   : > { %v3313_v33 = vpop.f32.mrb[7].mxu0  ;;  %v3318_v34 = vpop.f32.mrb[5].mxu1  ;;  %v1353_v37 = vsel %vm1349_vm5, %v1343_v29, -inf }
 0x3ee   : > { %v1346_v35 = vpop.f32.mrb[6].mxu1 }
 0x3ef   : > { %v3319_v36 = vpop.f32.mrb[7].mxu1 }
 0x3f0   : > { %1354 = vmax.xlane.f32.xlu0 %v1353_v37 }
 0x406   : > { %1472 = vrot.lane.b32.xlu0 %v4551_v5, %s4016_s3 }
 0x479   : > { %v1352_v38 = vpop.xlane.xlu0 %1351 }
 0x47a   : > { %v1356_v39 = vsub.f32 %v1297_v26, %v1352_v38 }
 0x47c   : > { %v1358_v40 = vmul.f32 1.442695, %v1356_v39 }
 0x47d   : > { %v1355_v41 = vpop.xlane.xlu0 %1354 }
 0x47e   : > { %3642 = vpow2.f32 %v1358_v40  ;;  %v1357_v42 = vsub.f32 %v1343_v29, %v1355_v41 }
 0x480   : > { %v1360_v43 = vmul.f32 1.442695, %v1357_v42 }
 0x481   : > { %v1473_v55 = vpop.permute.xlu0 %1472 }
 0x482   : > { %3644 = vpow2.f32 %v1360_v43  ;;  %v1478_v60 = vsel %vm1256_vm3, %v1473_v55, 0 }
 0x488   : > { %v3643_v44 = vpop.eup %3642 }
 0x489   : > { %v1362_v45 = vsel %vm1349_vm5, %v3643_v44, 0.0 }
 0x48a   : > { %1363 = vadd.xlane.f32.xlu1 %v1362_v45 }
 0x48c   : > { %v3645_v46 = vpop.eup %3644 }
 0x48d   : > { %v1365_v47 = vsel %vm1349_vm5, %v3645_v46, 0.0 }
 0x48e   : > { %1366 = vadd.xlane.f32.xlu1 %v1365_v47 }
 0x49f   : > { %1469 = vrot.lane.b32.xlu1 %v4563_v12, %s4016_s3 }
 0x4a3   : > { %1521 = vrot.lane.b32.xlu1 %v4565_v13, %s4016_s3 }
 0x517   : > { %v1364_v49 = vpop.xlane.xlu1 %1363 }
 0x518   : > { %3646 = vrcp.f32 %v1364_v49 }
 0x51b   : > { %v1367_v50 = vpop.xlane.xlu1 %1366 }
 0x51c   : > { %3648 = vrcp.f32 %v1367_v50 }
 0x51f   : > { %v1470_v1 = vpop.permute.xlu1 %1469 }
 0x522   : > { %v3647_v53 = vpop.eup %3646 }
 0x523   : > { %v1370_v54 = vmul.f32 %v3647_v53, %v3643_v44  ;;  %v1522_v2 = vpop.permute.xlu1 %1521 }
 0x525   : > { %v1372_v56 = vpack.c.bf16 %v1370_v54, %v1370_v54  ;;  %v3594_v54 = vld [vmem:[%s4487_s15] sm:$0xff]  }
 0x526   : > { %v3649_v57 = vpop.eup %3648 }
 0x527   : > { %v1371_v61 = vmul.f32 %v3649_v57, %v3645_v46  ;;  %3323 = vmatmul.mubr.msk.bf16.vlgmr.msra.gmra.mrb[8].mxu0 %vm1349_vm5, %v1372_v56  ;;  %v3597_v56 = vld [vmem:[%s4487_s15 + $0x18] sm:$0xff]   ;;  %v3595_v57 = vld [vmem:[%s4487_s15 + $0x8] sm:$0xff]  }
 0x528   : > { %3333 = vmatpush3.bf16.xpose.msra.mxu0 %v1478_v60  ;;  %3334 = vmatprep.mubr.msk.bf16.mxu0 %vm4015_vm2, %v4014_v31 }
 0x529   : > { %v1373_v63 = vpack.c.bf16 %v1371_v61, %v1371_v61  ;;  %3344 = vmatprep.subr.bf16.mxu0 %v4014_v31 }
 0x52b   : > { %3329 = vmatmul.mubr.msk.bf16.vlgmr.msra.gmra.mrb[8].mxu1 %vm1349_vm5, %v1373_v63 }
 0x52c   : > { %3339 = vmatpush3.bf16.xpose.msra.mxu1 %v1530_v0  ;;  %3340 = vmatprep.mubr.msk.bf16.mxu1 %vm4015_vm2, %v4014_v31 }
 0x52d   : > { %3350 = vmatprep.subr.bf16.mxu1 %v4014_v31 }
 0x52f   : > { %3335 = vmatmul.mubr.msk.bf16.vlgmr.msra.gmra.mrb[12].mxu0 %vm1256_vm3, %v1470_v1 }
 0x530   : > { %3346 = vmatprep.mubr.msk.bf16.mxu0 %vm4015_vm2, %v4014_v31 }
 0x533   : > { %3341 = vmatmul.mubr.msk.bf16.vlgmr.msra.gmra.mrb[12].mxu1 %vm1256_vm3, %v1522_v2 }
 0x534   : > { %3352 = vmatprep.mubr.msk.bf16.mxu1 %vm4015_vm2, %v4014_v31 }
 0x5fa   : > { %v4612_v3 = vpop.f32.mrb[8].mxu0 }
 0x5fb   : > { %v3324_v4 = vpop.f32.mrb[9].mxu0 }
 0x5fc   : > { %v1418_v6 = vpop.f32.mrb[10].mxu0 }
 0x5fd   : > { %v3325_v8 = vpop.f32.mrb[11].mxu0 }
 0x5fe   : > { %v4614_v9 = vpop.f32.mrb[8].mxu1 }
 0x5ff   : > { %v1467_v10 = vpack.c.bf16 %v4614_v9, %v4612_v3  ;;  %v3330_v11 = vpop.f32.mrb[9].mxu1 }
 0x600   : > { %v1464_v14 = vpop.f32.mrb[10].mxu1 }
 0x601   : > { %v3331_v15 = vpop.f32.mrb[11].mxu1 }
 0x602   : > { %v1514_v16 = vpop.f32.mrb[12].mxu0 }
 0x603   : > { %v3336_v17 = vpop.f32.mrb[13].mxu0  ;;  %v1572_v18 = vsel %vm1349_vm5, %v1514_v16, -inf }
 0x604   : > { %1573 = vmax.xlane.f32.xlu0 %v1572_v18  ;;  %v1517_v19 = vpop.f32.mrb[14].mxu0 }
 0x605   : > { %v3337_v20 = vpop.f32.mrb[15].mxu0 }
 0x606   : > { %v1566_v21 = vpop.f32.mrb[12].mxu1 }
 0x607   : > { %v3342_v24 = vpop.f32.mrb[13].mxu1  ;;  %v1575_v25 = vsel %vm1349_vm5, %v1566_v21, -inf }
 0x608   : > { %1576 = vmax.xlane.f32.xlu1 %v1575_v25  ;;  %v1569_v26 = vpop.f32.mrb[14].mxu1 }
 0x609   : > { %v3343_v27 = vpop.f32.mrb[15].mxu1 }
 0x619   : > { %1646 = vrot.lane.b32.xlu1 %v4578_v23, %s4016_s3 }
 0x61d   : > { %1809 = vrot.lane.b32.xlu1 %v4551_v5, %s4017_s6 }
 0x621   : > { %1859 = vrot.lane.b32.xlu1 %v4553_v7, %s4017_s6 }
 0x625   : > { %1857 = vrot.lane.b32.xlu1 %v4565_v13, %s4017_s6 }
 0x691   : > { %v1574_v28 = vpop.xlane.xlu0 %1573 }
 0x692   : > { %v1578_v29 = vsub.f32 %v1514_v16, %v1574_v28 }
 0x694   : > { %v1580_v32 = vmul.f32 1.442695, %v1578_v29 }
 0x695   : > { %v1577_v33 = vpop.xlane.xlu1 %1576 }
 0x696   : > { %3650 = vpow2.f32 %v1580_v32  ;;  %v1579_v34 = vsub.f32 %v1566_v21, %v1577_v33 }
 0x698   : > { %v1582_v35 = vmul.f32 1.442695, %v1579_v34 }
 0x699   : > { %v1647_v36 = vpop.permute.xlu1 %1646 }
 0x69a   : > { %3652 = vpow2.f32 %v1582_v35  ;;  %v1652_v37 = vsel %vm1377_vm4, %v1647_v36, 0 }
 0x69b   : > { %3351 = vmatpush3.bf16.msra.mxu1 %v1652_v37 }
 0x69c   : > { %3364 = vmatprep.subr.bf16.mxu1 %v4014_v31 }
 0x69d   : > { %v1810_v60 = vpop.permute.xlu1 %1809 }
 0x69e   : > { %v1815_v11 = vsel %vm1256_vm3, %v1810_v60, 0 }
 0x6a0   : > { %v3651_v38 = vpop.eup %3650 }
 0x6a1   : > { %v1584_v39 = vsel %vm1349_vm5, %v3651_v38, 0.0  ;;  %v1860_v61 = vpop.permute.xlu1 %1859 }
 0x6a2   : > { %1585 = vadd.xlane.f32.xlu0 %v1584_v39  ;;  %v1865_v63 = vsel %vm1256_vm3, %v1860_v61, 0 }
 0x6a4   : > { %v3653_v40 = vpop.eup %3652 }
 0x6a5   : > { %v1587_v41 = vsel %vm1349_vm5, %v3653_v40, 0.0  ;;  %v1858_v0 = vpop.permute.xlu1 %1857 }
 0x6a6   : > { %1588 = vadd.xlane.f32.xlu0 %v1587_v41 }
 0x6bc   : > { %1597 = vrot.lane.b32.xlu0 %v4576_v22, %s4016_s3 }
 0x6c0   : > { %1807 = vrot.lane.b32.xlu0 %v4563_v12, %s4017_s6 }
 0x72f   : > { %v1586_v42 = vpop.xlane.xlu0 %1585 }
 0x730   : > { %3654 = vrcp.f32 %v1586_v42 }
 0x733   : > { %v1589_v43 = vpop.xlane.xlu0 %1588 }
 0x734   : > { %3656 = vrcp.f32 %v1589_v43 }
 0x737   : > { %v1598_v44 = vpop.permute.xlu0 %1597 }
 0x738   : > { %v1603_v45 = vsel %vm1377_vm4, %v1598_v44, 0 }
 0x739   : > { %3345 = vmatpush3.bf16.msra.mxu0 %v1603_v45 }
 0x73a   : > { %v3655_v46 = vpop.eup %3654  ;;  %3356 = vmatprep.subr.bf16.mxu0 %v4014_v31 }
 0x73b   : > { %v1592_v47 = vmul.f32 %v3655_v46, %v3651_v38  ;;  %v1808_v17 = vpop.permute.xlu0 %1807 }
 0x73d   : > { %v1594_v49 = vpack.c.bf16 %v1592_v47, %v1592_v47 }
 0x73e   : > { %v3657_v50 = vpop.eup %3656 }
 0x73f   : > { %v1593_v53 = vmul.f32 %v3657_v50, %v3653_v40  ;;  %3347 = vmatmul.mubr.msk.bf16.vlgmr.msra.gmra.mrb[16].mxu0 %vm1349_vm5, %v1594_v49 }
 0x740   : > { %3357 = vmatpush3.bf16.msra.mxu0 %v3596_v48  ;;  %3360 = vmatprep.mubr.msk.bf16.mxu0 %vm4015_vm2, %v4014_v31 }
 0x741   : > { %v1595_v55 = vpack.c.bf16 %v1593_v53, %v1593_v53  ;;  %3358 = vmatprep.subr.bf16.mxu0 %v4014_v31 }
 0x743   : > { %3353 = vmatmul.mubr.msk.bf16.vlgmr.msra.gmra.mrb[16].mxu1 %vm1349_vm5, %v1595_v55 }
 0x744   : > { %3365 = vmatpush3.bf16.msra.mxu1 %v3594_v54  ;;  %3368 = vmatprep.mubr.msk.bf16.mxu1 %vm4015_vm2, %v4014_v31 }
 0x745   : > { %3366 = vmatprep.subr.bf16.mxu1 %v4014_v31  ;;  %3359 = vmatpush3.bf16.msra.mxu0 %v3597_v56 }
 0x746   : > { %3372 = vmatprep.subr.bf16.mxu0 %v4014_v31 }
 0x748   : > { %3367 = vmatpush3.bf16.msra.mxu1 %v3595_v57 }
 0x749   : > { %3378 = vmatprep.subr.bf16.mxu1 %v4014_v31 }
 0x74b   : > { %3369 = vmatmul.mubr.msk.bf16.vlgmr.msra.gmra.mrb[20].mxu1 %vm1256_vm3, %v1467_v10 }
 0x74c   : > { %3380 = vmatprep.mubr.msk.bf16.mxu1 %vm4015_vm2, %v4014_v31 }
 0x751   : > { %3379 = vmatpush3.bf16.xpose.msra.mxu1 %v1865_v63 }
 0x752   : > { %3390 = vmatprep.subr.bf16.mxu1 %v4014_v31 }
 0x758   : > { %3381 = vmatmul.mubr.msk.bf16.vlgmr.msra.gmra.mrb[24].mxu1 %vm1256_vm3, %v1858_v0 }
 0x759   : > { %3392 = vmatprep.mubr.msk.bf16.mxu1 %vm4015_vm2, %v4014_v31 }
 0x812   : > { %v1639_v1 = vpop.f32.mrb[16].mxu0 }
 0x813   : > { %v3348_v2 = vpop.f32.mrb[17].mxu0 }
 0x814   : > { %v1642_v3 = vpop.f32.mrb[18].mxu0  ;;  %v3598_v2 = vld [vmem:[%s4487_s15 + $0x20] sm:$0xff]  }
 0x815   : > { %v3349_v4 = vpop.f32.mrb[19].mxu0 }
 0x816   : > { %v1688_v6 = vpop.f32.mrb[16].mxu1 }
 0x817   : > { %v1694_v8 = vpack.c.bf16 %v1688_v6, %v1639_v1  ;;  %v3354_v9 = vpop.f32.mrb[17].mxu1 }
 0x818   : > { %v1691_v10 = vpop.f32.mrb[18].mxu1  ;;  %v3599_v9 = vld [vmem:[%s4487_s15 + $0x28] sm:$0xff]  }
 0x819   : > { %v3355_v14 = vpop.f32.mrb[19].mxu1  ;;  %3361 = vmatmul.mubr.msk.bf16.vlgmr.msra.gmra.mrb[20].mxu0 %vm1256_vm3, %v1694_v8 }
 0x81a   : > { %3373 = vmatpush3.bf16.xpose.msra.mxu0 %v1815_v11  ;;  %3374 = vmatprep.mubr.msk.bf16.mxu0 %vm4015_vm2, %v4014_v31 }
 0x81b   : > { %3384 = vmatprep.subr.bf16.mxu0 %v4014_v31 }
 0x81e   : > { %v1800_v15 = vpop.f32.mrb[20].mxu1 }
 0x81f   : > { %v3370_v16 = vpop.f32.mrb[21].mxu1 }
 0x820   : > { %v1803_v18 = vpop.f32.mrb[22].mxu1 }
 0x821   : > { %v3371_v19 = vpop.f32.mrb[23].mxu1  ;;  %3375 = vmatmul.mubr.msk.bf16.vlgmr.msra.gmra.mrb[24].mxu0 %vm1256_vm3, %v1808_v17 }
 0x822   : > { %3386 = vmatprep.mubr.msk.bf16.mxu0 %vm4015_vm2, %v4014_v31 }
 0x82b   : > { %v1901_v20 = vpop.f32.mrb[24].mxu1 }
 0x82c   : > { %v3382_v21 = vpop.f32.mrb[25].mxu1  ;;  %v1910_v24 = vsel %vm1349_vm5, %v1901_v20, -inf }
 0x82d   : > { %1911 = vmax.xlane.f32.xlu1 %v1910_v24  ;;  %v1904_v25 = vpop.f32.mrb[26].mxu1 }
 0x82e   : > { %v3383_v26 = vpop.f32.mrb[27].mxu1 }
 0x83e   : > { %1979 = vrot.lane.b32.xlu1 %v4578_v23, %s4017_s6 }
 0x842   : > { %2088 = vrot.lane.b32.xlu1 %v4551_v5, %s4018_s17 }
 0x846   : > { %2138 = vrot.lane.b32.xlu1 %v4553_v7, %s4018_s17 }
 0x84a   : > { %2136 = vrot.lane.b32.xlu1 %v4565_v13, %s4018_s17 }
 0x8ba   : > { %v1912_v27 = vpop.xlane.xlu1 %1911 }
 0x8bb   : > { %v1914_v32 = vsub.f32 %v1901_v20, %v1912_v27 }
 0x8bd   : > { %v1917_v33 = vmul.f32 1.442695, %v1914_v32 }
 0x8be   : > { %v1980_v28 = vpop.permute.xlu1 %1979 }
 0x8bf   : > { %v1985_v29 = vsel %vm1377_vm4, %v1980_v28, 0  ;;  %3658 = vpow2.f32 %v1917_v33 }
 0x8c0   : > { %3391 = vmatpush3.bf16.msra.mxu1 %v1985_v29 }
 0x8c1   : > { %3404 = vmatprep.subr.bf16.mxu1 %v4014_v31 }
 0x8c2   : > { %v2089_v54 = vpop.permute.xlu1 %2088 }
 0x8c3   : > { %v2094_v56 = vsel %vm1256_vm3, %v2089_v54, 0 }
 0x8c6   : > { %v2139_v17 = vpop.permute.xlu1 %2138 }
 0x8c7   : > { %v2144_v24 = vsel %vm1256_vm3, %v2139_v17, 0 }
 0x8c9   : > { %v3659_v40 = vpop.eup %3658 }
 0x8ca   : > { %v1922_v43 = vsel %vm1349_vm5, %v3659_v40, 0.0  ;;  %v2137_v26 = vpop.permute.xlu1 %2136 }
 0x8ec   : > { %v1744_v34 = vpop.f32.mrb[20].mxu0 }
 0x8ed   : > { %v4682_v35 = vadd.f32 %v1800_v15, %v1744_v34  ;;  %v3362_v5 = vpop.f32.mrb[21].mxu0 }
 0x8ee   : > { %v1747_v36 = vpop.f32.mrb[22].mxu0 }
 0x8ef   : > { %v4684_v37 = vadd.f32 %v1803_v18, %v1747_v36  ;;  %v3363_v7 = vpop.f32.mrb[23].mxu0 }
 0x8f4   : > { %v1851_v38 = vpop.f32.mrb[24].mxu0 }
 0x8f5   : > { %v3376_v13 = vpop.f32.mrb[25].mxu0  ;;  %v1907_v39 = vsel %vm1349_vm5, %v1851_v38, -inf }
 0x8f6   : > { %1908 = vmax.xlane.f32.xlu0 %v1907_v39  ;;  %v1854_v41 = vpop.f32.mrb[26].mxu0 }
 0x8f7   : > { %v3377_v42 = vpop.f32.mrb[27].mxu0 }
 0x8fa   : > { %1923 = vadd.xlane.f32.xlu0 %v1922_v43 }
 0x983   : > { %v1909_v44 = vpop.xlane.xlu0 %1908 }
 0x984   : > { %v1913_v45 = vsub.f32 %v1851_v38, %v1909_v44 }
 0x986   : > { %v1915_v46 = vmul.f32 1.442695, %v1913_v45 }
 0x987   : > { %v1924_v47 = vpop.xlane.xlu0 %1923 }
 0x988   : > { %3660 = vpow2.f32 %v1915_v46 }
 0x989   : > { %3662 = vrcp.f32 %v1924_v47 }
 0x992   : > { %v3661_v48 = vpop.eup %3660 }
 0x993   : > { %v3663_v49 = vpop.eup %3662  ;;  %v1919_v50 = vsel %vm1349_vm5, %v3661_v48, 0.0 }
 0x994   : > { %v1928_v53 = vmul.f32 %v3663_v49, %v3659_v40  ;;  %1920 = vadd.xlane.f32.xlu0 %v1919_v50 }
 0x996   : > { %v1930_v55 = vpack.c.bf16 %v1928_v53, %v1928_v53 }
 0x998   : > { %3393 = vmatmul.mubr.msk.bf16.vlgmr.msra.gmra.mrb[28].mxu1 %vm1349_vm5, %v1930_v55 }
 0x999   : > { %3405 = vmatpush3.bf16.xpose.msra.mxu1 %v2094_v56  ;;  %3406 = vmatprep.mubr.msk.bf16.mxu1 %vm4015_vm2, %v4014_v31 }
 0x99a   : > { %3416 = vmatprep.subr.bf16.mxu1 %v4014_v31 }
 0x9aa   : > { %1931 = vrot.lane.b32.xlu0 %v4576_v22, %s4017_s6 }
 0x9ae   : > { %2086 = vrot.lane.b32.xlu0 %v4563_v12, %s4018_s17 }
 0xa21   : > { %v1921_v57 = vpop.xlane.xlu0 %1920 }
 0xa22   : > { %3664 = vrcp.f32 %v1921_v57 }
 0xa25   : > { %v1932_v60 = vpop.permute.xlu0 %1931 }
 0xa26   : > { %v1937_v61 = vsel %vm1377_vm4, %v1932_v60, 0 }
 0xa27   : > { %3385 = vmatpush3.bf16.msra.mxu0 %v1937_v61  ;;  %v3600_v61 = vld [vmem:[%s4487_s15 + $0x30] sm:$0xff]  }
 0xa28   : > { %3396 = vmatprep.subr.bf16.mxu0 %v4014_v31 }
 0xa29   : > { %v2087_v63 = vpop.permute.xlu0 %2086 }
 0xa2a   : > { %3407 = vmatmul.mubr.msk.bf16.vlgmr.msra.gmra.mrb[32].mxu1 %vm1256_vm3, %v2087_v63  ;;  %v3601_v63 = vld [vmem:[%s4487_s15 + $0x38] sm:$0xff]  }
 0xa2b   : > { %3418 = vmatprep.mubr.msk.bf16.mxu1 %vm4015_vm2, %v4014_v31 }
 0xa2c   : > { %v3665_v0 = vpop.eup %3664 }
 0xa2d   : > { %v1927_v1 = vmul.f32 %v3665_v0, %v3661_v48 }
 0xa2f   : > { %v1929_v3 = vpack.c.bf16 %v1927_v1, %v1927_v1 }
 0xa31   : > { %3387 = vmatmul.mubr.msk.bf16.vlgmr.msra.gmra.mrb[28].mxu0 %vm1349_vm5, %v1929_v3 }
 0xa32   : > { %3397 = vmatpush3.bf16.msra.mxu0 %v3598_v2  ;;  %3400 = vmatprep.mubr.msk.bf16.mxu0 %vm4015_vm2, %v4014_v31 }
 0xa33   : > { %3398 = vmatprep.subr.bf16.mxu0 %v4014_v31 }
 0xa36   : > { %3399 = vmatpush3.bf16.msra.mxu0 %v3599_v9 }
 0xa37   : > { %3410 = vmatprep.subr.bf16.mxu0 %v4014_v31 }
 0xa6b   : > { %v2021_v12 = vpop.f32.mrb[28].mxu1 }
 0xa6c   : > { %v3394_v4 = vpop.f32.mrb[29].mxu1 }
 0xa6d   : > { %v2024_v6 = vpop.f32.mrb[30].mxu1 }
 0xa6e   : > { %v3395_v8 = vpop.f32.mrb[31].mxu1 }
 0xafd   : > { %v2130_v10 = vpop.f32.mrb[32].mxu1 }
 0xafe   : > { %v3408_v11 = vpop.f32.mrb[33].mxu1  ;;  %v2186_v14 = vsel %vm1349_vm5, %v2130_v10, -inf }
 0xaff   : > { %2187 = vmax.xlane.f32.xlu0 %v2186_v14  ;;  %v2133_v15 = vpop.f32.mrb[34].mxu1 }
 0xb00   : > { %v3409_v16 = vpop.f32.mrb[35].mxu1 }
 0xb04   : > { %v1973_v18 = vpop.f32.mrb[28].mxu0 }
 0xb05   : > { %v2027_v19 = vpack.c.bf16 %v2021_v12, %v1973_v18  ;;  %v3388_v20 = vpop.f32.mrb[29].mxu0 }
 0xb06   : > { %v1976_v21 = vpop.f32.mrb[30].mxu0 }
 0xb07   : > { %v3389_v25 = vpop.f32.mrb[31].mxu0  ;;  %3401 = vmatmul.mubr.msk.bf16.vlgmr.msra.gmra.mrb[32].mxu0 %vm1256_vm3, %v2027_v19  ;;  %v3602_v21 = vld [vmem:[%s4489_s27] ss:$8 sps:$4 sm:$0xff]  }
 0xb08   : > { %3411 = vmatpush3.bf16.xpose.msra.mxu0 %v2144_v24  ;;  %3412 = vmatprep.mubr.msk.bf16.mxu0 %vm4015_vm2, %v4014_v31  ;;  %v3604_v24 = vld [vmem:[%s4489_s27 + $0x4] ss:$8 sps:$4 sm:$0xff]   ;;  %v3607_v25 = vld [vmem:[%s4489_s27 + $0x14] ss:$8 sps:$4 sm:$0xff]  }
 0xb09   : > { %3422 = vmatprep.subr.bf16.mxu0 %v4014_v31 }
 0xb0f   : > { %3413 = vmatmul.mubr.msk.bf16.vlgmr.msra.gmra.mrb[36].mxu0 %vm1256_vm3, %v2137_v26  ;;  %v3605_v26 = vld [vmem:[%s4489_s27 + $0x10] ss:$8 sps:$4 sm:$0xff]  }
 0xb10   : > { %3424 = vmatprep.mubr.msk.bf16.mxu0 %vm4015_vm2, %v4014_v31 }
 0xb8c   : > { %v2188_v27 = vpop.xlane.xlu0 %2187 }
 0xb8d   : > { %v2192_v28 = vsub.f32 %v2130_v10, %v2188_v27 }
 0xb8f   : > { %v2194_v29 = vmul.f32 1.442695, %v2192_v28 }
 0xb91   : > { %3666 = vpow2.f32 %v2194_v29 }
 0xb9b   : > { %v3667_v32 = vpop.eup %3666 }
 0xb9c   : > { %v2198_v33 = vsel %vm1349_vm5, %v3667_v32, 0.0 }
 0xb9d   : > { %2199 = vadd.xlane.f32.xlu0 %v2198_v33 }
 0xbda   : > { %v2077_v34 = vpop.f32.mrb[32].mxu0 }
 0xbdb   : > { %v2084_v5 = vadd.f32 %v2077_v34, %v4682_v35  ;;  %v3402_v36 = vpop.f32.mrb[33].mxu0 }
 0xbdc   : > { %v2080_v7 = vpop.f32.mrb[34].mxu0  ;;  %v3608_v36 = vld [vmem:[%s4489_s27 + $0x20] ss:$8 sps:$4 sm:$0xff]  }
 0xbdd   : > { %v2085_v38 = vadd.f32 %v2080_v7, %v4684_v37  ;;  %v3403_v13 = vpop.f32.mrb[35].mxu0  ;;  %v3613_v7 = vld [vmem:[%s4489_s27 + $0x34] ss:$8 sps:$4 sm:$0xff]  }
 0xbde   : > { %v3616_v13 = vld [vmem:[%s4489_s27 + $0x44] ss:$8 sps:$4 sm:$0xff]  }
 0xbe2   : > { %v2180_v39 = vpop.f32.mrb[36].mxu0 }
 0xbe3   : > { %v3414_v40 = vpop.f32.mrb[37].mxu0  ;;  %v2189_v41 = vsel %vm1349_vm5, %v2180_v39, -inf }
 0xbe4   : > { %2190 = vmax.xlane.f32.xlu1 %v2189_v41  ;;  %v2183_v42 = vpop.f32.mrb[38].mxu0  ;;  %v3619_v40 = vld [vmem:[%s4489_s27 + $0x54] ss:$8 sps:$4 sm:$0xff]   ;;  %v3617_v41 = vld [vmem:[%s4489_s27 + $0x50] ss:$8 sps:$4 sm:$0xff]  }
 0xbe5   : > { %v3415_v43 = vpop.f32.mrb[39].mxu0  ;;  %v3620_v42 = vld [vmem:[%s4489_s27 + $0x60] ss:$8 sps:$4 sm:$0xff]  }
 0xbe6   : > { %v3622_v43 = vld [vmem:[%s4489_s27 + $0x64] ss:$8 sps:$4 sm:$0xff]  }
 0xbf5   : > { %2258 = vrot.lane.b32.xlu1 %v4578_v23, %s4018_s17 }
 0xc2a   : > { %v2200_v49 = vpop.xlane.xlu0 %2199 }
 0xc71   : > { %v2191_v44 = vpop.xlane.xlu1 %2190 }
 0xc72   : > { %v2193_v45 = vsub.f32 %v2180_v39, %v2191_v44  ;;  %v3614_v39 = vld [vmem:[%s4489_s27 + $0x40] ss:$8 sps:$4 sm:$0xff]   ;;  %v3625_v44 = vld [vmem:[%s4489_s27 + $0x74] ss:$8 sps:$4 sm:$0xff]  }
 0xc74   : > { %v2196_v46 = vmul.f32 1.442695, %v2193_v45  ;;  %v3623_v45 = vld [vmem:[%s4489_s27 + $0x70] ss:$8 sps:$4 sm:$0xff]  }
 0xc75   : > { %v2259_v47 = vpop.permute.xlu1 %2258 }
 0xc76   : > { %3668 = vpow2.f32 %v2196_v46  ;;  %v2264_v35 = vsel %vm1377_vm4, %v2259_v47, 0  ;;  %v3626_v46 = vld [vmem:[%s4491_s18 + $0x40] sm:$0xff]  }
 0xc77   : > { %3423 = vmatpush3.bf16.msra.mxu0 %v2264_v35  ;;  %3670 = vrcp.f32 %v2200_v49  ;;  %v3627_v47 = vld [vmem:[%s4491_s18] sm:$0xff]   ;;  %v3628_v35 = vld [vmem:[%s4491_s18 + $0x48] sm:$0xff]   ;;  %v3631_v49 = vld [vmem:[%s4491_s18 + $0x10] sm:$0xff]  }
 0xc78   : > { %2525 = vmatprep.subr.bf16.mxu0 %v3604_v24 }
 0xc80   : > { %v3669_v37 = vpop.eup %3668 }
 0xc81   : > { %v2201_v48 = vsel %vm1349_vm5, %v3669_v37, 0.0  ;;  %v3671_v50 = vpop.eup %3670 }
 0xc82   : > { %2202 = vadd.xlane.f32.xlu0 %v2201_v48  ;;  %v2206_v53 = vmul.f32 %v3671_v50, %v3667_v32  ;;  %v3630_v48 = vld [vmem:[%s4491_s18 + $0x50] sm:$0xff]   ;;  %v3632_v50 = vld [vmem:[%s4491_s18 + $0x58] sm:$0xff]  }
 0xc84   : > { %v2208_v56 = vpack.c.bf16 %v2206_v53, %v2206_v53  ;;  %v3634_v53 = vld [vmem:[%s4491_s18 + $0x60] sm:$0xff]  }
 0xc98   : > { %2210 = vrot.lane.b32.xlu0 %v4576_v22, %s4018_s17  ;;  %s4975_s17 = sld [smem:[#allocation37_spill]] (!%p3195_p13) }
 0xd0f   : > { %v2203_v23 = vpop.xlane.xlu0 %2202 }
 0xd10   : > { %3672 = vrcp.f32 %v2203_v23  ;;  %v3633_v23 = vld [vmem:[%s4491_s18 + $0x18] sm:$0xff]  }
 0xd13   : > { %v2211_v54 = vpop.permute.xlu0 %2210 }
 0xd14   : > { %v2216_v55 = vsel %vm1377_vm4, %v2211_v54, 0  ;;  %v3635_v54 = vld [vmem:[%s4491_s18 + $0x20] sm:$0xff]  }
 0xd15   : > { %3417 = vmatpush3.bf16.msra.mxu1 %v2216_v55  ;;  %v3636_v55 = vld [vmem:[%s4491_s18 + $0x68] sm:$0xff]  }
 0xd16   : > { %3428 = vmatprep.subr.bf16.mxu1 %v4014_v31 }
 0xd18   : > { %3419 = vmatmul.mubr.msk.bf16.vlgmr.msra.gmra.mrb[36].mxu1 %vm1349_vm5, %v2208_v56 }
 0xd19   : > { %3432 = vmatprep.mubr.msk.bf16.mxu1 %vm4015_vm2, %v4014_v31  ;;  %3429 = vmatpush3.bf16.msra.mxu1 %v3600_v61 }
 0xd1a   : > { %v3673_v22 = vpop.eup %3672  ;;  %3430 = vmatprep.subr.bf16.mxu1 %v4014_v31 }
 0xd1b   : > { %v2207_v57 = vmul.f32 %v3673_v22, %v3669_v37  ;;  %v3629_v37 = vld [vmem:[%s4491_s18 + $0x8] sm:$0xff]  }
 0xd1d   : > { %v2209_v60 = vpack.c.bf16 %v2207_v57, %v2207_v57  ;;  %3431 = vmatpush3.bf16.msra.mxu1 %v3601_v63 }
 0xd1e   : > { %3260 = vmatprep.subr.bf16.mxu1 %v3626_v46 }
 0xd1f   : > { %3425 = vmatmul.mubr.msk.bf16.vlgmr.msra.gmra.mrb[40].mxu0 %vm1349_vm5, %v2209_v60 }
 0xd20   : > { %2557 = vmatprep.mubr.bf16.mxu0 %v4013_v30  ;;  %v3157_v30 = vld [vmem:[%s4967_s26] ss:$0 sm:$0xff]  ;;  %2526 = vmatpush1.bf16.msra.mxu0 %v3602_v21 }
 0xd21   : > { %2527 = vmatprep.subr.bf16.mxu0 %v3607_v25 }
 0xd24   : > { %2528 = vmatpush1.bf16.msra.mxu0 %v3605_v26 }
 0xdeb   : > { %v2252_v0 = vpop.f32.mrb[36].mxu1 }
 0xdec   : > { %v3420_v1 = vpop.f32.mrb[37].mxu1 }
 0xded   : > { %v2255_v2 = vpop.f32.mrb[38].mxu1  ;;  %v3158_v1 = vld [vmem:[%s4968_s10] ss:$0 sm:$0xff] }
 0xdee   : > { %v3421_v3 = vpop.f32.mrb[39].mxu1 }
 0xdf2   : > { %v2300_v12 = vpop.f32.mrb[40].mxu0 }
 0xdf3   : > { %v2306_v4 = vpack.c.bf16 %v2300_v12, %v2252_v0  ;;  %v3426_v6 = vpop.f32.mrb[41].mxu0 }
 0xdf4   : > { %v2303_v8 = vpop.f32.mrb[42].mxu0  ;;  %v3159_v6 = vld [vmem:[%s4970_s4] ss:$0 sm:$0xff] }
 0xdf5   : > { %v3427_v9 = vpop.f32.mrb[43].mxu0  ;;  %3433 = vmatmul.mubr.msk.bf16.vlgmr.msra.gmra.mrb[40].mxu1 %vm1256_vm3, %v2306_v4 }
 0xdf6   : > { %3261 = vmatpush3.bf16.msra.mxu1 %v3627_v47 }
 0xdf7   : > { %3262 = vmatprep.subr.bf16.mxu1 %v3628_v35 }
 0xdfa   : > { %3263 = vmatpush3.bf16.msra.mxu1 %v3629_v37 }
 0xdfb   : > { %3264 = vmatprep.subr.bf16.mxu1 %v3630_v48 }
 0xdfe   : > { %3265 = vmatpush3.bf16.msra.mxu1 %v3631_v49 }
 0xdff   : > { %3266 = vmatprep.subr.bf16.mxu1 %v3632_v50 }
 0xe02   : > { %3267 = vmatpush3.bf16.msra.mxu1 %v3633_v23 }
 0xe03   : > { %3268 = vmatprep.subr.bf16.mxu1 %v3634_v53 }
 0xe06   : > { %3269 = vmatpush3.bf16.msra.mxu1 %v3635_v54 }
 0xe07   : > { %3270 = vmatprep.subr.bf16.mxu1 %v3636_v55 }
 0xec8   : > { %v2356_v31 = vpop.f32.mrb[40].mxu1 }
 0xec9   : > { %v2363_v10 = vadd.f32 %v2356_v31, %v2084_v5  ;;  %v3434_v11 = vpop.f32.mrb[41].mxu1  ;;  %v3610_v5 = vld [vmem:[%s4489_s27 + $0x24] ss:$8 sps:$4 sm:$0xff]  }
 0xeca   : > { %v2359_v14 = vpop.f32.mrb[42].mxu1  ;;  %2529 = vmatprep.subr.bf16.mxu0 %v3610_v5  ;;  %v3638_v11 = vld [vmem:[%s4491_s18 + $0x70] sm:$0xff]  }
 0xecb   : > { %v2371_v15 = vadd.f32 %v3157_v30, %v2363_v10  ;;  %v2364_v16 = vadd.f32 %v2359_v14, %v2085_v38  ;;  %v3435_v17 = vpop.f32.mrb[43].mxu1  ;;  %2530 = vmatpush1.bf16.msra.mxu0 %v3608_v36  ;;  %v3611_v38 = vld [vmem:[%s4489_s27 + $0x30] ss:$8 sps:$4 sm:$0xff]   ;;  %v3637_v10 = vld [vmem:[%s4491_s18 + $0x28] sm:$0xff]  }
 0xecc   : > { %2531 = vmatprep.subr.bf16.mxu0 %v3613_v7  ;;  %3271 = vmatpush3.bf16.msra.mxu1 %v3637_v10  ;;  %v3639_v14 = vld [vmem:[%s4491_s18 + $0x30] sm:$0xff]  }
 0xecd   : > { %v2372_v18 = vadd.f32 %v3157_v30, %v2364_v16  ;;  %v2373_v19 = vadd.f32 %v2371_v15, %v4521_v51  ;;  %3272 = vmatprep.subr.bf16.mxu1 %v3638_v11  ;;  %v3640_v15 = vld [vmem:[%s4491_s18 + $0x78] sm:$0xff]   ;;  %v2433_v17 = vld [vmem:[%s4473_s16] sm:$0x3] }
 0xece   : > { %v3641_v16 = vld [vmem:[%s4491_s18 + $0x38] sm:$0xff]  }
 0xecf   : > { %2377 = vadd.xlane.f32.xlu1 %v2373_v19  ;;  %v2374_v20 = vadd.f32 %v2372_v18, %v4523_v52  ;;  %2532 = vmatpush1.bf16.msra.mxu0 %v3611_v38  ;;  %v2438_v18 = vrot.slane %v2433_v17, %v1008_v62 }
 0xed0   : > { %2533 = vmatprep.subr.bf16.mxu0 %v3616_v13  ;;  %3273 = vmatpush3.bf16.msra.mxu1 %v3639_v14 }
 0xed1   : > { %2379 = vadd.xlane.f32.xlu0 %v2374_v20  ;;  %3274 = vmatprep.subr.bf16.mxu1 %v3640_v15 }
 0xed3   : > { %2534 = vmatpush1.bf16.msra.mxu0 %v3614_v39 }
 0xed4   : > { %2535 = vmatprep.subr.bf16.mxu0 %v3619_v40  ;;  %3275 = vmatpush3.bf16.msra.mxu1 %v3641_v16 }
 0xed7   : > { %2536 = vmatpush1.bf16.msra.mxu0 %v3617_v41 }
 0xed8   : > { %2537 = vmatprep.subr.bf16.mxu0 %v3622_v43 }
 0xedb   : > { %2538 = vmatpush1.bf16.msra.mxu0 %v3620_v42 }
 0xedc   : > { %2539 = vmatprep.subr.bf16.mxu0 %v3625_v44 }
 0xedf   : > { %2540 = vmatpush1.bf16.msra.mxu0 %v3623_v45 }
 0xf5c   : > { %v2378_v27 = vpop.xlane.xlu1 %2377 }
 0xf5d   : > { %v2382_v28 = vmul.f32 0.0078125, %v2378_v27 }
 0xf5e   : > { %v2380_v29 = vpop.xlane.xlu0 %2379 }
 0xf5f   : > { %v4751_v51 = vsub.f32 %v2373_v19, %v2382_v28  ;;  %v2383_v52 = vmul.f32 0.0078125, %v2380_v29  ;;  %v2442_v19 = vrot.slane %v2433_v17, %v1012_v59 }
 0xf61   : > { %v4753_v32 = vsub.f32 %v2374_v20, %v2383_v52  ;;  %v2386_v33 = vmul.f32 %v4751_v51, %v4751_v51 }
 0xf63   : > { %2388 = vadd.xlane.f32.xlu0 %v2386_v33  ;;  %v2387_v34 = vmul.f32 %v4753_v32, %v4753_v32 }
 0xf65   : > { %2390 = vadd.xlane.f32.xlu1 %v2387_v34 }
 0xff0   : > { %v2389_v56 = vpop.xlane.xlu0 %2388 }
 0xff1   : > { %v2392_v22 = vmul.f32 0.0078125, %v2389_v56 }
 0xff2   : > { %v2391_v57 = vpop.xlane.xlu1 %2390 }
 0xff3   : > { %v2394_v60 = vadd.f32 1e-05, %v2392_v22  ;;  %v2393_v61 = vmul.f32 0.0078125, %v2391_v57  ;;  %v3193_v22 = vld [vmem:[%s859_s30] ss:$0 sm:$0xff] }
 0xff5   : > { %3674 = vrsqrt.f32 %v2394_v60  ;;  %v2395_v63 = vadd.f32 1e-05, %v2393_v61  ;;  %v3194_v61 = vld [vmem:[%s862_s22] ss:$0 sm:$0xff]  ;;  %s4974_s22 = sld [smem:[#allocation36_spill]] (!%p3195_p13) }
 0xff7   : > { %3676 = vrsqrt.f32 %v2395_v63 }
 0xfff   : > { %v3675_v0 = vpop.eup %3674 }
0x1000   : > { %v2398_v2 = vmul.f32 %v3675_v0, %v4751_v51 }
0x1001   : > { %v3677_v3 = vpop.eup %3676 }
0x1002   : > { %v2399_v12 = vmul.f32 %v3677_v3, %v4753_v32  ;;  %v2406_v4 = vmul.f32 %v3158_v1, %v2398_v2 }
0x1004   : > { %v2407_v8 = vmul.f32 %v3158_v1, %v2399_v12  ;;  %v2414_v9 = vadd.f32 %v3159_v6, %v2406_v4 }
0x1006   : > { %v2415_v30 = vadd.f32 %v3159_v6, %v2407_v8 }
0x1008   : > { %v2416_v31 = vpack.c.bf16 %v2415_v30, %v2414_v9 }
0x100a   : > { %2558 = vmatmul.mubr.bf16.vlgmr.msra.gmra.mrb[44].mxu0 %v2416_v31 }
0x10dd   : > { %v2559_v20 = vpop.f32.mrb[44].mxu0 }
0x10de   : > { %v2560_v21 = vadd.f32 %v2559_v20, %v2438_v18  ;;  %v2561_v24 = vpop.f32.mrb[45].mxu0  ;;  %v3196_v20 = vld [vmem:[%s4974_s22] ss:$0 sm:$0xff] (!%p3195_p13) }
0x10df   : > { %v2562_v25 = vadd.f32 %v2561_v24, %v2442_v19  ;;  %v2563_v26 = vpop.f32.mrb[46].mxu0  ;;  %v3197_v24 = vld [vmem:[%s4975_s17] ss:$0 sm:$0xff] (!%p3195_p13) }
0x10e0   : > { %v2564_v27 = vadd.f32 %v2563_v26, %v2438_v18  ;;  %v2565_v28 = vpop.f32.mrb[47].mxu0  ;;  %v2568_v51 = vmax.f32 %v2560_v21, 0.0 }
0x10e1   : > { %v2566_v29 = vadd.f32 %v2565_v28, %v2442_v19  ;;  %v2569_v32 = vmax.f32 %v2562_v25, 0.0 }
0x10e2   : > { %v2570_v52 = vmax.f32 %v2564_v27, 0.0 }
0x10e3   : > { %v2571_v33 = vmax.f32 %v2566_v29, 0.0 }
0x10e4   : > { %v2572_v34 = vpack.c.bf16 %v2570_v52, %v2568_v51 }
0x10e5   : > { %v2573_v5 = vpack.c.bf16 %v2571_v33, %v2569_v32 }
0x10e7   : > { %2741 = vmatprep.mubr.bf16.mxu1 %v2573_v5 }
0x10e8   : > { %2742 = vmatmul.mubr.bf16.vlgmr.msra.gmra.mrb[44].mxu1 %v2572_v34 }
0x11bb   : > { %v3276_v62 = vpop.f32.mrb[44].mxu1 }
0x11bc   : > { %v3277_v59 = vpop.f32.mrb[45].mxu1 }
0x11bd   : > { %v3278_v36 = vadd.f32 %v3277_v59, %v3276_v62  ;;  %v3279_v7 = vpop.f32.mrb[46].mxu1 }
0x11be   : > { %v3280_v38 = vpop.f32.mrb[47].mxu1 }
0x11bf   : > { %v2744_v13 = vadd.f32 %v3278_v36, %v3176_v58  ;;  %v3281_v39 = vadd.f32 %v3280_v38, %v3279_v7 }
0x11c1   : > { %v2747_v40 = vadd.f32 %v3281_v39, %v3176_v58  ;;  %v2750_v41 = vadd.f32 %v2744_v13, %v2414_v9 }
0x11c3   : > { %2754 = vadd.xlane.f32.xlu0 %v2750_v41  ;;  %v2751_v42 = vadd.f32 %v2747_v40, %v2415_v30 }
0x11c5   : > { %2756 = vadd.xlane.f32.xlu1 %v2751_v42 }
0x1250   : > { %v2755_v43 = vpop.xlane.xlu0 %2754 }
0x1251   : > { %v2758_v44 = vmul.f32 0.0078125, %v2755_v43 }
0x1252   : > { %v2757_v45 = vpop.xlane.xlu1 %2756 }
0x1253   : > { %v2760_v46 = vsub.f32 %v2750_v41, %v2758_v44  ;;  %v2759_v47 = vmul.f32 0.0078125, %v2757_v45 }
0x1255   : > { %v2761_v35 = vsub.f32 %v2751_v42, %v2759_v47  ;;  %v2762_v37 = vmul.f32 %v2760_v46, %v2760_v46 }
0x1257   : > { %2764 = vadd.xlane.f32.xlu0 %v2762_v37  ;;  %v2763_v48 = vmul.f32 %v2761_v35, %v2761_v35 }
0x1259   : > { %2766 = vadd.xlane.f32.xlu1 %v2763_v48 }
0x12e4   : > { %v2765_v49 = vpop.xlane.xlu0 %2764 }
0x12e5   : > { %v2768_v50 = vmul.f32 0.0078125, %v2765_v49 }
0x12e6   : > { %v2767_v23 = vpop.xlane.xlu1 %2766 }
0x12e7   : > { %v2770_v53 = vadd.f32 1e-05, %v2768_v50  ;;  %v2769_v54 = vmul.f32 0.0078125, %v2767_v23 }
0x12e9   : > { %3678 = vrsqrt.f32 %v2770_v53  ;;  %v2771_v55 = vadd.f32 1e-05, %v2769_v54 }
0x12eb   : > { %3680 = vrsqrt.f32 %v2771_v55 }
0x12f3   : > { %v3679_v56 = vpop.eup %3678 }
0x12f4   : > { %v2774_v57 = vmul.f32 %v3679_v56, %v2760_v46 }
0x12f5   : > { %v3681_v60 = vpop.eup %3680 }
0x12f6   : > { %v2782_v63 = vmul.f32 %v3193_v22, %v2774_v57  ;;  %v2775_v0 = vmul.f32 %v3681_v60, %v2761_v35  ;;  %2797 = sbr.rel (%p3195_p13) target bundleno = 5174 (0x1436), region = 132 }
0x12f8   : > { %v2790_v1 = vadd.f32 %v3194_v61, %v2782_v63  ;;  %v2783_v2 = vmul.f32 %v3193_v22, %v2775_v0 }
0x12fa   : > { %2792 = vst [vmem:[#allocation14] sm:$0xff] %v2790_v1  ;;  %v2791_v3 = vadd.f32 %v3194_v61, %v2783_v2  ;;  %2800 = vadd.xlane.f32.xlu0 (!%p3195_p13), %v2790_v1 }
0x12fc   : > { %2793 = vst [vmem:[#allocation14 + $0x8] sm:$0xff] %v2791_v3 }
0x12fe   : > { %2802 = vadd.xlane.f32.xlu0 %v2791_v3 }
0x1387   : > { %v2801_v12 = vpop.xlane.xlu0 %2800 }
0x1388   : > { %v2804_v4 = vmul.f32 0.0078125, %v2801_v12 }
0x138a   : > { %v2806_v6 = vsub.f32 %v2790_v1, %v2804_v4 }
0x138b   : > { %v2803_v8 = vpop.xlane.xlu0 %2802 }
0x138c   : > { %v2805_v9 = vmul.f32 0.0078125, %v2803_v8  ;;  %v2808_v30 = vmul.f32 %v2806_v6, %v2806_v6 }
0x138e   : > { %v2807_v31 = vsub.f32 %v2791_v3, %v2805_v9  ;;  %2810 = vadd.xlane.f32.xlu1 %v2808_v30 }
0x1390   : > { %v2809_v10 = vmul.f32 %v2807_v31, %v2807_v31 }
0x1392   : > { %2812 = vadd.xlane.f32.xlu1 %v2809_v10 }
0x141b   : > { %v2811_v11 = vpop.xlane.xlu1 %2810 }
0x141c   : > { %v2814_v14 = vmul.f32 0.0078125, %v2811_v11 }
0x141e   : > { %v2816_v15 = vadd.f32 1e-05, %v2814_v14 }
0x141f   : > { %v2813_v16 = vpop.xlane.xlu1 %2812 }
0x1420   : > { %3682 = vrsqrt.f32 %v2816_v15  ;;  %v2815_v17 = vmul.f32 0.0078125, %v2813_v16 }
0x1422   : > { %v2817_v18 = vadd.f32 1e-05, %v2815_v17 }
0x1424   : > { %3684 = vrsqrt.f32 %v2817_v18 }
0x142a   : > { %v3683_v19 = vpop.eup %3682 }
0x142b   : > { %v2820_v21 = vmul.f32 %v3683_v19, %v2806_v6 }
0x142d   : > { %v2828_v25 = vmul.f32 %v3196_v20, %v2820_v21 }
0x142e   : > { %v3685_v26 = vpop.eup %3684 }
0x142f   : > { %v2836_v27 = vadd.f32 %v3197_v24, %v2828_v25  ;;  %v2821_v28 = vmul.f32 %v3685_v26, %v2807_v31 }
0x1431   : > { %2838 = vst [vmem:[#allocation14] sm:$0xff] %v2836_v27  ;;  %v2829_v29 = vmul.f32 %v3196_v20, %v2821_v28 }
0x1433   : > { %v2837_v51 = vadd.f32 %v3197_v24, %v2829_v29 }
0x1435   : > { %2839 = vst [vmem:[#allocation14 + $0x8] sm:$0xff] %v2837_v51 }
0x1436 PF: > { %p3503_p3 = scmp.eq.s32.totalorder %s4136_s0, 1  ;;  %s4019_s21 = smov [#allocation14]  }
0x1437   : > { %s2846_s19 = sshll.u32 %s4019_s21, 4  ;;  %s2847_s19 = int_to_ptr.vmem [resolvable:$true] %s2846_s19 }
0x1438   : > { %s3918_s26 = scalar_lea.vmem %s2847_s19, 256  ;;  %p3925_p7 = scmp.lt.s32.totalorder %s2847_s19, %s2847_s19 }
0x1439   : > { %p3919_p9 = scmp.ne.s32.totalorder %s2847_s19, %s3918_s26  ;;  %p3926_p8 = scmp.lt.s32.totalorder %s3918_s26, %s3918_s26 }
0x143b   : > { %p3920_p2 = pnand %p3919_p9, %p3503_p3  ;;  %p3927_p12 = por %p3926_p8, %p3925_p7 }
0x143d   : > { %p3921_p5 = pneg %p3920_p2 }
0x143f   : > { %p3928_p4 = pnand %p3927_p12, %p3921_p5 }
0x1441   : > { %3931 = shalt.err (!%p3928_p4)
}
0x1442   : > { %s4976_s10 = sld [smem:[#allocation38_spill]] }
0x1448   : > { %s3932_s29 = scalar_lea.hbm %s4976_s10, 256 }
0x1449   : > { %p3933_p1 = scmp.ne.s32.totalorder %s4976_s10, %s3932_s29  ;;  %p3938_p11 = scmp.lt.u32.totalorder %s3932_s29, %s4976_s10 }
0x144b   : > { %p3934_p10 = pnand %p3933_p1, %p3503_p3 }
0x144d   : > { %p3935_p6 = pneg %p3934_p10 }
0x144f   : > { %p3940_p0 = pnand %p3938_p11, %p3935_p6 }
0x1451   : > { %3943 = shalt.err (!%p3940_p0)
}
0x1452   : > { %s4020_s11 = smov 128   ;;  %s4021_s2 = smov 8  }
0x1453   : > { %3465 = dma.vmem_to_hbm [thread:$0]  (%p3503_p3), %s2847_s19, 256, %s4976_s10, [#allocation4], %s4020_s11, %s4020_s11, %s4021_s2  }
0x1454   : > { %3977 = dma.done.wait (%p3503_p3), [#allocation4], 256  }
0x1455   : > { %3979 = vsyncadd (%p3503_p3), [#allocation4], 4294967040 }
0x1456 PF: > { %s4977_s30 = sld [smem:[#allocation21_spill]]  ;;  %s4978_s24 = sld [smem:[#allocation20_spill]] }
0x1457   : > { %s4979_s29 = sld [smem:[#allocation22_spill]]  ;;  %s4980_s27 = smov %s3986_s28 }
0x145c   : > { %p29_p13 = scmp.ge.s32.totalorder %s4977_s30, 4   ;;  %s4981_s28 = smov %s4978_s24 }
0x145e   :  { %31 = sbr.rel (!%p29_p13) target bundleno = 22 (0x16), region = 209 }
0x1465   :  { %2862 = vsyncpa [#allocation3], 1 }
0x1466   :  { %2864 = vsyncpa [#allocation3 + $0x1], 1 }
0x1467   :  { %2865 = vsyncpa [#allocation6], 1 }
0x1468   :  { %2866 = vsyncpa [#allocation9], 1 }
0x1469   :  { %2867 = vsyncpa [#allocation4], 1 }
0x146a   :  { %2869 = vsyncpa [#allocation4 + $0x1], 1 }

</bundles_post_ra>
